<compile_context>
chip_gen: v5e
topology: v5e:2x2
jax: 0.10.0
libtpu: 0.0.40
codegen_flags: <defaults>
</compile_context>

<pallas_src>
import functools
import math

import jax
import jax.numpy as jnp
import numpy as np
from jax.experimental import pallas as pl
from jax.experimental.pallas import tpu as pltpu

LANE = 128


def _round_up(x, m):
    return ((x + m - 1) // m) * m


# ---------------------------------------------------------------------------
# Kernel 1: one LightGCN layer on the packed slab, fused with the running
# layer-sum:    h_out = graph @ h_in ;   acc_out = acc_in + h_out
# Tiled (tile x tile) over the dense graph, f32 accumulation in VMEM scratch.
# ---------------------------------------------------------------------------
def _prop_layer_kernel(g_ref, h_ref, acc_in_ref, h_out_ref, acc_out_ref, acc_sc):
    k = pl.program_id(1)

    @pl.when(k == 0)
    def _init():
        acc_sc[...] = jnp.zeros_like(acc_sc)

    acc_sc[...] += jnp.dot(g_ref[...], h_ref[...],
                           preferred_element_type=jnp.float32)

    @pl.when(k == pl.num_programs(1) - 1)
    def _finalize():
        h_new = acc_sc[...]
        h_out_ref[...] = h_new.astype(h_out_ref.dtype)
        acc_out_ref[...] = acc_in_ref[...] + h_new


def _propagate_layer(graph, h, acc, tile):
    # TODO(synk): on v5e-class chips cast graph/h to bf16 here (keep the f32
    # accumulator) to halve HBM traffic; kept f32 to match torch numerics.
    np_, dp = h.shape
    gi = np_ // tile
    return pl.pallas_call(
        _prop_layer_kernel,
        out_shape=(jax.ShapeDtypeStruct((np_, dp), h.dtype),
                   jax.ShapeDtypeStruct((np_, dp), jnp.float32)),
        grid_spec=pltpu.PrefetchScalarGridSpec(
            num_scalar_prefetch=0,
            grid=(gi, gi),
            in_specs=[pl.BlockSpec((tile, tile), lambda i, k: (i, k)),
                      pl.BlockSpec((tile, dp), lambda i, k: (k, 0)),
                      pl.BlockSpec((tile, dp), lambda i, k: (i, 0))],
            out_specs=[pl.BlockSpec((tile, dp), lambda i, k: (i, 0)),
                       pl.BlockSpec((tile, dp), lambda i, k: (i, 0))],
            scratch_shapes=[pltpu.VMEM((tile, dp), jnp.float32)],
        ),
        compiler_params=pltpu.CompilerParams(
            dimension_semantics=("parallel", "arbitrary"),
            vmem_limit_bytes=32 * 1024 * 1024),
    )(graph, h, acc)


# ---------------------------------------------------------------------------
# Kernel 2: fused DICE scores + BPR losses + MSE discrepancy -> scalar loss.
# Inputs are packed (B*K, 128) rows [int | pop | pad]; the int/pop split is
# done with a lane mask so the dot products stay full-lane-width.
# ---------------------------------------------------------------------------
def _fused_loss_kernel(u_ref, ipp_ref, ipn_ref, mask_ref,
                       fip_ref, fin_ref, fu_ref, out_ref,
                       *, emb_dim, int_weight, pop_weight, dis_pen):
    u = u_ref[...]          # (BK, Dp)
    ipp = ipp_ref[...]
    ipn = ipn_ref[...]
    mask = mask_ref[...]    # (BK, 1)
    first_ip = fip_ref[...]
    first_in = fin_ref[...]
    first_u = fu_ref[...]

    dp = u.shape[-1]
    lane = jax.lax.broadcasted_iota(jnp.int32, (1, dp), 1)
    int_mask = (lane < emb_dim).astype(jnp.float32)

    prod_p = u * ipp
    prod_n = u * ipn
    # pad lanes are zero, so the full-lane sum is exactly p_int + p_pop
    p_tot = jnp.sum(prod_p, axis=-1, keepdims=True)
    n_tot = jnp.sum(prod_n, axis=-1, keepdims=True)
    p_int = jnp.sum(prod_p * int_mask, axis=-1, keepdims=True)
    n_int = jnp.sum(prod_n * int_mask, axis=-1, keepdims=True)
    p_pop = p_tot - p_int
    n_pop = n_tot - n_int

    def log_sig(x):  # numerically-stable log(sigmoid(x))
        return jnp.minimum(x, 0.0) - jnp.log(1.0 + jnp.exp(-jnp.abs(x)))

    loss_int = -jnp.mean(mask * log_sig(p_int - n_int))
    loss_pop = (-jnp.mean(mask * log_sig(n_pop - p_pop))
                - jnp.mean((1.0 - mask) * log_sig(p_pop - n_pop)))
    loss_total = -jnp.mean(log_sig(p_tot - n_tot))

    def row_ssq(x):  # per-row sum_d (int_d - pop_d)^2  -> (R, 1)
        d = x[:, :emb_dim] - x[:, emb_dim:2 * emb_dim]
        return jnp.sum(d * d, axis=-1, keepdims=True)

    # exact torch.unique replacement: weight only first occurrences, divide by
    # (num_unique * emb_dim) to match nn.MSELoss(reduction='mean').
    n_uniq_item = jnp.sum(first_ip) + jnp.sum(first_in)
    n_uniq_user = jnp.sum(first_u)
    mse_item = (jnp.sum(first_ip * row_ssq(ipp))
                + jnp.sum(first_in * row_ssq(ipn))) / (n_uniq_item * emb_dim)
    mse_user = jnp.sum(first_u * row_ssq(u)) / (n_uniq_user * emb_dim)
    discrepancy = mse_item + mse_user

    out_ref[0] = (int_weight * loss_int + pop_weight * loss_pop
                  + loss_total - dis_pen * discrepancy)


def _fused_losses(u_pk, ipp_pk, ipn_pk, mask_f, first_ip, first_in, first_u,
                  *, emb_dim, int_weight, pop_weight, dis_pen):
    kern = functools.partial(_fused_loss_kernel, emb_dim=emb_dim,
                             int_weight=float(int_weight),
                             pop_weight=float(pop_weight),
                             dis_pen=float(dis_pen))
    out = pl.pallas_call(
        kern,
        out_shape=jax.ShapeDtypeStruct((1,), jnp.float32),
        in_specs=[pl.BlockSpec(memory_space=pltpu.MemorySpace.VMEM)] * 7,
        out_specs=pl.BlockSpec(memory_space=pltpu.MemorySpace.SMEM),
    )(u_pk, ipp_pk, ipn_pk, mask_f, first_ip, first_in, first_u)
    return out[0]


# ---------------------------------------------------------------------------
# On-device, static-shape replacement for torch.unique-based row dedup.
# ---------------------------------------------------------------------------
def _first_occurrence_mask(idx):
    """1.0 at the first occurrence of each value in idx, else 0.0."""
    eq = idx[:, None] == idx[None, :]
    earlier = jnp.tril(eq, k=-1).any(axis=1)
    return jnp.where(earlier, 0.0, 1.0).astype(jnp.float32)


# ---------------------------------------------------------------------------
# Full forward (jit-ed, stays on device end-to-end).
# ---------------------------------------------------------------------------
@functools.partial(
    jax.jit,
    static_argnames=("n_user", "emb_dim", "num_layers",
                     "int_weight", "pop_weight", "dis_pen"))
def _lgndice_forward(emb_int, emb_pop, graph, user, item_p, item_n, mask, *,
                     n_user, emb_dim, num_layers,
                     int_weight, pop_weight, dis_pen):
    n_tot = emb_int.shape[0]
    dp = _round_up(2 * emb_dim, LANE)              # lane-dense packed width
    np_ = max(_round_up(n_tot, LANE), LANE)        # row-padded node count
    tile = 256 if (np_ % 256 == 0 and np_ >= 256) else LANE

    # pack [int | pop | pad] along lanes; zero-pad rows to the tile grid
    packed = jnp.zeros((np_, dp), jnp.float32)
    packed = packed.at[:n_tot, :emb_dim].set(emb_int)
    packed = packed.at[:n_tot, emb_dim:2 * emb_dim].set(emb_pop)
    graph_p = jnp.zeros((np_, np_), jnp.float32).at[:n_tot, :n_tot].set(graph)

    h = packed
    acc = packed
    for _ in range(num_layers):
        # TODO(synk): F.dropout between layers omitted (module is used with
        # dropout=0.0, so this is an exact no-op).
        h, acc = _propagate_layer(graph_p, h, acc, tile)
    features = acc * (1.0 / float(num_layers + 1))  # packed layer-mean

    user_f = user.reshape(-1).astype(jnp.int32)
    item_p_f = item_p.reshape(-1).astype(jnp.int32) + n_user
    item_n_f = item_n.reshape(-1).astype(jnp.int32) + n_user
    bk = user_f.shape[0]

    u_pk = jnp.take(features, user_f, axis=0)       # (BK, Dp) packed rows
    ipp_pk = jnp.take(features, item_p_f, axis=0)
    ipn_pk = jnp.take(features, item_n_f, axis=0)

    mask_f = mask.reshape(bk, 1).astype(jnp.float32)
    first_item = _first_occurrence_mask(jnp.concatenate([item_p_f, item_n_f]))
    first_ip = first_item[:bk].reshape(bk, 1)
    first_in = first_item[bk:].reshape(bk, 1)
    first_u = _first_occurrence_mask(user_f).reshape(bk, 1)

    return _fused_losses(u_pk, ipp_pk, ipn_pk, mask_f, first_ip, first_in,
                         first_u, emb_dim=emb_dim, int_weight=int_weight,
                         pop_weight=pop_weight, dis_pen=dis_pen)


# ---------------------------------------------------------------------------
# Module wrapper
# ---------------------------------------------------------------------------
class LGNDICEPallas:
    def __init__(self, num_users, num_items, embedding_size, num_layers,
                 dropout, dis_loss, dis_pen, int_weight, pop_weight, key):
        assert dis_loss == 'L2', "only the MSE discrepancy branch is implemented"
        self.n_user = num_users
        self.n_item = num_items
        self.emb_dim = embedding_size
        self.num_layers = num_layers
        self.dropout = dropout
        self.dis_pen = float(dis_pen)
        self.int_weight = float(int_weight)
        self.pop_weight = float(pop_weight)
        stdv = 1.0 / math.sqrt(embedding_size)
        k1, k2 = jax.random.split(key)
        n_tot = num_users + num_items
        self.embeddings_int = jax.random.uniform(
            k1, (n_tot, embedding_size), jnp.float32, -stdv, stdv)
        self.embeddings_pop = jax.random.uniform(
            k2, (n_tot, embedding_size), jnp.float32, -stdv, stdv)

    def forward(self, user, item_p, item_n, mask, graph, training=True):
        return _lgndice_forward(
            self.embeddings_int, self.embeddings_pop, graph,
            user, item_p, item_n, mask,
            n_user=self.n_user, emb_dim=self.emb_dim,
            num_layers=self.num_layers,
            int_weight=self.int_weight, pop_weight=self.pop_weight,
            dis_pen=self.dis_pen)


# ---------------------------------------------------------------------------
# Pure-JAX reference (mirrors the torch module; host np.unique is test-only)
# ---------------------------------------------------------------------------
def reference_loss(model, user, item_p, item_n, mask, graph):
    def feats(emb):
        h = emb
        acc = emb
        for _ in range(model.num_layers):
            h = jnp.dot(graph, h)
            acc = acc + h
        return acc / float(model.num_layers + 1)

    fi = feats(model.embeddings_int)
    fp = feats(model.embeddings_pop)
    ip = item_p + model.n_user
    inn = item_n + model.n_user
    ui, up = fi[user], fp[user]
    pi_i, pi_p = fi[ip], fp[ip]
    ni_i, ni_p = fi[inn], fp[inn]
    p_int = (ui * pi_i).sum(-1)
    n_int = (ui * ni_i).sum(-1)
    p_pop = (up * pi_p).sum(-1)
    n_pop = (up * ni_p).sum(-1)
    m = mask.astype(jnp.float32)
    ls = jax.nn.log_sigmoid
    loss_int = -jnp.mean(m * ls(p_int - n_int))
    loss_pop = (-jnp.mean(m * ls(n_pop - p_pop))
                - jnp.mean((1.0 - m) * ls(p_pop - n_pop)))
    loss_total = -jnp.mean(ls(p_int + p_pop - n_int - n_pop))
    item_all = jnp.asarray(np.unique(np.concatenate(
        [np.asarray(ip).ravel(), np.asarray(inn).ravel()])))
    user_all = jnp.asarray(np.unique(np.asarray(user).ravel()))
    mse = lambda a, b: jnp.mean((a - b) ** 2)
    disc = mse(fi[item_all], fp[item_all]) + mse(fi[user_all], fp[user_all])
    return (model.int_weight * loss_int + model.pop_weight * loss_pop
            + loss_total - model.dis_pen * disc)


if __name__ == "__main__":
    key = jax.random.PRNGKey(0)
    k_emb, k_graph, k_u, k_ip, k_in, k_mask = jax.random.split(key, 6)

    num_users, num_items, D, L = 16, 48, 32, 2
    N = num_users + num_items
    B, K = 8, 4

    model = LGNDICEPallas(num_users, num_items, D, L,
                          dropout=0.0, dis_loss='L2', dis_pen=0.1,
                          int_weight=0.5, pop_weight=0.5, key=k_emb)

    # dense symmetric-normalized bipartite adjacency as the "graph"
    adj_ui = (jax.random.uniform(k_graph, (num_users, num_items)) < 0.2).astype(jnp.float32)
    adj = jnp.zeros((N, N), jnp.float32)
    adj = adj.at[:num_users, num_users:].set(adj_ui)
    adj = adj.at[num_users:, :num_users].set(adj_ui.T)
    deg = jnp.clip(adj.sum(axis=1), 1.0, None)
    dinv = 1.0 / jnp.sqrt(deg)
    graph = adj * dinv[:, None] * dinv[None, :]

    user = jax.random.randint(k_u, (B, K), 0, num_users)
    item_p = jax.random.randint(k_ip, (B, K), 0, num_items)
    item_n = jax.random.randint(k_in, (B, K), 0, num_items)
    mask = jax.random.bernoulli(k_mask, 0.5, (B, K))

    loss = model.forward(user, item_p, item_n, mask, graph, training=True)
    loss = jax.block_until_ready(loss)

    ref = reference_loss(model, user, item_p, item_n, mask, graph)
    assert np.isfinite(float(loss))
    np.testing.assert_allclose(float(loss), float(ref), rtol=2e-3, atol=1e-4)
    print("KERNEL_OK")
</pallas_src>

<mosaic_0001>
module attributes {stable_mosaic.version = 11 : i64} {
  func.func @_prop_layer_kernel(%arg0: i32, %arg1: i32, %arg2: memref<128x128xf32, #tpu.memory_space<vmem>>, %arg3: memref<128x128xf32, #tpu.memory_space<vmem>>, %arg4: memref<128x128xf32, #tpu.memory_space<vmem>>, %arg5: memref<128x128xf32, #tpu.memory_space<vmem>>, %arg6: memref<128x128xf32, #tpu.memory_space<vmem>>, %arg7: memref<128x128xf32, #tpu.memory_space<vmem>>) attributes {dimension_semantics = [#tpu.dimension_semantics<parallel>, #tpu.dimension_semantics<arbitrary>], iteration_bounds = array<i64: 1, 1>, scalar_prefetch = 0 : i64, scratch_operands = 1 : i64, tpu.core_type = #tpu.core_type<tc>, window_params = [{transform_indices = @transform_0, window_bounds = array<i64: 128, 128>}, {transform_indices = @transform_1, window_bounds = array<i64: 128, 128>}, {transform_indices = @transform_2, window_bounds = array<i64: 128, 128>}, {transform_indices = @transform_3, window_bounds = array<i64: 128, 128>}, {transform_indices = @transform_4, window_bounds = array<i64: 128, 128>}]} {
    %c0_i32 = arith.constant 0 : i32
    %0 = arith.cmpi eq, %arg1, %c0_i32 : i32
    %1 = arith.extui %0 : i1 to i32
    %c0_i32_0 = arith.constant 0 : i32
    %2 = arith.cmpi ne, %1, %c0_i32_0 : i32
    scf.if %2 {
      %cst_10 = arith.constant 0.000000e+00 : f32
      %12 = vector.broadcast %cst_10 : f32 to vector<128x128xf32>
      %c0_11 = arith.constant 0 : index
      %c0_12 = arith.constant 0 : index
      %13 = vector.load %arg7[%c0_11, %c0_12] : memref<128x128xf32, #tpu.memory_space<vmem>>, vector<128x128xf32>
      tpu.vector_store %arg7[%c0_11, %c0_12], %12 {strides = array<i32>} : memref<128x128xf32, #tpu.memory_space<vmem>>, vector<128x128xf32>,
    } else {
    }
    %c0 = arith.constant 0 : index
    %c0_1 = arith.constant 0 : index
    %3 = vector.load %arg7[%c0, %c0_1] : memref<128x128xf32, #tpu.memory_space<vmem>>, vector<128x128xf32>
    %c0_2 = arith.constant 0 : index
    %c0_3 = arith.constant 0 : index
    %4 = vector.load %arg2[%c0_2, %c0_3] : memref<128x128xf32, #tpu.memory_space<vmem>>, vector<128x128xf32>
    %c0_4 = arith.constant 0 : index
    %c0_5 = arith.constant 0 : index
    %5 = vector.load %arg3[%c0_4, %c0_5] : memref<128x128xf32, #tpu.memory_space<vmem>>, vector<128x128xf32>
    %cst = arith.constant dense<0.000000e+00> : vector<128x128xf32>
    %6 = tpu.matmul %4, %5, %cst {dimension_numbers = #tpu.dot_dimension_numbers<[1], [0], [0], [1], [0, 0, 1, 1], [], []>} : vector<128x128xf32>, vector<128x128xf32>, vector<128x128xf32> -> vector<128x128xf32>
    %7 = arith.addf %3, %6 : vector<128x128xf32>
    %c0_6 = arith.constant 0 : index
    %c0_7 = arith.constant 0 : index
    %8 = vector.load %arg7[%c0_6, %c0_7] : memref<128x128xf32, #tpu.memory_space<vmem>>, vector<128x128xf32>
    tpu.vector_store %arg7[%c0_6, %c0_7], %7 {strides = array<i32>} : memref<128x128xf32, #tpu.memory_space<vmem>>, vector<128x128xf32>,
    %c0_i32_8 = arith.constant 0 : i32
    %9 = arith.cmpi eq, %arg1, %c0_i32_8 : i32
    %10 = arith.extui %9 : i1 to i32
    %c0_i32_9 = arith.constant 0 : i32
    %11 = arith.cmpi ne, %10, %c0_i32_9 : i32
    scf.if %11 {
      %c0_10 = arith.constant 0 : index
      %c0_11 = arith.constant 0 : index
      %12 = vector.load %arg7[%c0_10, %c0_11] : memref<128x128xf32, #tpu.memory_space<vmem>>, vector<128x128xf32>
      %c0_12 = arith.constant 0 : index
      %c0_13 = arith.constant 0 : index
      %13 = vector.load %arg5[%c0_12, %c0_13] : memref<128x128xf32, #tpu.memory_space<vmem>>, vector<128x128xf32>
      tpu.vector_store %arg5[%c0_12, %c0_13], %12 {strides = array<i32>} : memref<128x128xf32, #tpu.memory_space<vmem>>, vector<128x128xf32>,
      %c0_14 = arith.constant 0 : index
      %c0_15 = arith.constant 0 : index
      %14 = vector.load %arg4[%c0_14, %c0_15] : memref<128x128xf32, #tpu.memory_space<vmem>>, vector<128x128xf32>
      %15 = arith.addf %14, %12 : vector<128x128xf32>
      %c0_16 = arith.constant 0 : index
      %c0_17 = arith.constant 0 : index
      %16 = vector.load %arg6[%c0_16, %c0_17] : memref<128x128xf32, #tpu.memory_space<vmem>>, vector<128x128xf32>
      tpu.vector_store %arg6[%c0_16, %c0_17], %15 {strides = array<i32>} : memref<128x128xf32, #tpu.memory_space<vmem>>, vector<128x128xf32>,
    } else {
    }
    return
  }
  func.func @transform_0(%arg0: i32, %arg1: i32) -> (i32, i32) {
    %c0_i32 = arith.constant 0 : i32
    return %arg0, %arg1 : i32, i32
  }
  func.func @transform_1(%arg0: i32, %arg1: i32) -> (i32, i32) {
    %c0_i32 = arith.constant 0 : i32
    %c0_i32_0 = arith.constant 0 : i32
    return %arg1, %c0_i32 : i32, i32
  }
  func.func @transform_2(%arg0: i32, %arg1: i32) -> (i32, i32) {
    %c0_i32 = arith.constant 0 : i32
    %c0_i32_0 = arith.constant 0 : i32
    return %arg0, %c0_i32 : i32, i32
  }
  func.func @transform_3(%arg0: i32, %arg1: i32) -> (i32, i32) {
    %c0_i32 = arith.constant 0 : i32
    %c0_i32_0 = arith.constant 0 : i32
    return %arg0, %c0_i32 : i32, i32
  }
  func.func @transform_4(%arg0: i32, %arg1: i32) -> (i32, i32) {
    %c0_i32 = arith.constant 0 : i32
    %c0_i32_0 = arith.constant 0 : i32
    return %arg0, %c0_i32 : i32, i32
  }
}

module attributes {stable_mosaic.version = 11 : i64} {
  func.func @_prop_layer_kernel(%arg0: i32, %arg1: i32, %arg2: memref<128x128xf32, #tpu.memory_space<vmem>>, %arg3: memref<128x128xf32, #tpu.memory_space<vmem>>, %arg4: memref<128x128xf32, #tpu.memory_space<vmem>>, %arg5: memref<128x128xf32, #tpu.memory_space<vmem>>, %arg6: memref<128x128xf32, #tpu.memory_space<vmem>>, %arg7: memref<128x128xf32, #tpu.memory_space<vmem>>) attributes {dimension_semantics = [#tpu.dimension_semantics<parallel>, #tpu.dimension_semantics<arbitrary>], iteration_bounds = array<i64: 1, 1>, scalar_prefetch = 0 : i64, scratch_operands = 1 : i64, tpu.core_type = #tpu.core_type<tc>, window_params = [{transform_indices = @transform_0, window_bounds = array<i64: 128, 128>}, {transform_indices = @transform_1, window_bounds = array<i64: 128, 128>}, {transform_indices = @transform_2, window_bounds = array<i64: 128, 128>}, {transform_indices = @transform_3, window_bounds = array<i64: 128, 128>}, {transform_indices = @transform_4, window_bounds = array<i64: 128, 128>}]} {
    %c0_i32 = arith.constant 0 : i32
    %0 = arith.cmpi eq, %arg1, %c0_i32 : i32
    %1 = arith.extui %0 : i1 to i32
    %c0_i32_0 = arith.constant 0 : i32
    %2 = arith.cmpi ne, %1, %c0_i32_0 : i32
    scf.if %2 {
      %cst_10 = arith.constant 0.000000e+00 : f32
      %12 = vector.broadcast %cst_10 : f32 to vector<128x128xf32>
      %c0_11 = arith.constant 0 : index
      %c0_12 = arith.constant 0 : index
      %13 = vector.load %arg7[%c0_11, %c0_12] : memref<128x128xf32, #tpu.memory_space<vmem>>, vector<128x128xf32>
      tpu.vector_store %arg7[%c0_11, %c0_12], %12 {strides = array<i32>} : memref<128x128xf32, #tpu.memory_space<vmem>>, vector<128x128xf32>,
    } else {
    }
    %c0 = arith.constant 0 : index
    %c0_1 = arith.constant 0 : index
    %3 = vector.load %arg7[%c0, %c0_1] : memref<128x128xf32, #tpu.memory_space<vmem>>, vector<128x128xf32>
    %c0_2 = arith.constant 0 : index
    %c0_3 = arith.constant 0 : index
    %4 = vector.load %arg2[%c0_2, %c0_3] : memref<128x128xf32, #tpu.memory_space<vmem>>, vector<128x128xf32>
    %c0_4 = arith.constant 0 : index
    %c0_5 = arith.constant 0 : index
    %5 = vector.load %arg3[%c0_4, %c0_5] : memref<128x128xf32, #tpu.memory_space<vmem>>, vector<128x128xf32>
    %cst = arith.constant dense<0.000000e+00> : vector<128x128xf32>
    %6 = tpu.matmul %4, %5, %cst {dimension_numbers = #tpu.dot_dimension_numbers<[1], [0], [0], [1], [0, 0, 1, 1], [], []>} : vector<128x128xf32>, vector<128x128xf32>, vector<128x128xf32> -> vector<128x128xf32>
    %7 = arith.addf %3, %6 : vector<128x128xf32>
    %c0_6 = arith.constant 0 : index
    %c0_7 = arith.constant 0 : index
    %8 = vector.load %arg7[%c0_6, %c0_7] : memref<128x128xf32, #tpu.memory_space<vmem>>, vector<128x128xf32>
    tpu.vector_store %arg7[%c0_6, %c0_7], %7 {strides = array<i32>} : memref<128x128xf32, #tpu.memory_space<vmem>>, vector<128x128xf32>,
    %c0_i32_8 = arith.constant 0 : i32
    %9 = arith.cmpi eq, %arg1, %c0_i32_8 : i32
    %10 = arith.extui %9 : i1 to i32
    %c0_i32_9 = arith.constant 0 : i32
    %11 = arith.cmpi ne, %10, %c0_i32_9 : i32
    scf.if %11 {
      %c0_10 = arith.constant 0 : index
      %c0_11 = arith.constant 0 : index
      %12 = vector.load %arg7[%c0_10, %c0_11] : memref<128x128xf32, #tpu.memory_space<vmem>>, vector<128x128xf32>
      %c0_12 = arith.constant 0 : index
      %c0_13 = arith.constant 0 : index
      %13 = vector.load %arg5[%c0_12, %c0_13] : memref<128x128xf32, #tpu.memory_space<vmem>>, vector<128x128xf32>
      tpu.vector_store %arg5[%c0_12, %c0_13], %12 {strides = array<i32>} : memref<128x128xf32, #tpu.memory_space<vmem>>, vector<128x128xf32>,
      %c0_14 = arith.constant 0 : index
      %c0_15 = arith.constant 0 : index
      %14 = vector.load %arg4[%c0_14, %c0_15] : memref<128x128xf32, #tpu.memory_space<vmem>>, vector<128x128xf32>
      %15 = arith.addf %14, %12 : vector<128x128xf32>
      %c0_16 = arith.constant 0 : index
      %c0_17 = arith.constant 0 : index
      %16 = vector.load %arg6[%c0_16, %c0_17] : memref<128x128xf32, #tpu.memory_space<vmem>>, vector<128x128xf32>
      tpu.vector_store %arg6[%c0_16, %c0_17], %15 {strides = array<i32>} : memref<128x128xf32, #tpu.memory_space<vmem>>, vector<128x128xf32>,
    } else {
    }
    return
  }
  func.func @transform_0(%arg0: i32, %arg1: i32) -> (i32, i32) {
    %c0_i32 = arith.constant 0 : i32
    return %arg0, %arg1 : i32, i32
  }
  func.func @transform_1(%arg0: i32, %arg1: i32) -> (i32, i32) {
    %c0_i32 = arith.constant 0 : i32
    %c0_i32_0 = arith.constant 0 : i32
    return %arg1, %c0_i32 : i32, i32
  }
  func.func @transform_2(%arg0: i32, %arg1: i32) -> (i32, i32) {
    %c0_i32 = arith.constant 0 : i32
    %c0_i32_0 = arith.constant 0 : i32
    return %arg0, %c0_i32 : i32, i32
  }
  func.func @transform_3(%arg0: i32, %arg1: i32) -> (i32, i32) {
    %c0_i32 = arith.constant 0 : i32
    %c0_i32_0 = arith.constant 0 : i32
    return %arg0, %c0_i32 : i32, i32
  }
  func.func @transform_4(%arg0: i32, %arg1: i32) -> (i32, i32) {
    %c0_i32 = arith.constant 0 : i32
    %c0_i32_0 = arith.constant 0 : i32
    return %arg0, %c0_i32 : i32, i32
  }
}

module attributes {stable_mosaic.version = 11 : i64} {
  func.func @_fused_loss_kernel(%arg0: memref<32x128xf32, #tpu.memory_space<vmem>>, %arg1: memref<32x128xf32, #tpu.memory_space<vmem>>, %arg2: memref<32x128xf32, #tpu.memory_space<vmem>>, %arg3: memref<32x1xf32, #tpu.memory_space<vmem>>, %arg4: memref<32x1xf32, #tpu.memory_space<vmem>>, %arg5: memref<32x1xf32, #tpu.memory_space<vmem>>, %arg6: memref<32x1xf32, #tpu.memory_space<vmem>>, %arg7: memref<1xf32, #tpu.memory_space<smem>>) attributes {dimension_semantics = [], scalar_prefetch = 0 : i64, scratch_operands = 0 : i64, tpu.core_type = #tpu.core_type<tc>} {
    %c0 = arith.constant 0 : index
    %c0_0 = arith.constant 0 : index
    %0 = vector.load %arg0[%c0, %c0_0] : memref<32x128xf32, #tpu.memory_space<vmem>>, vector<32x128xf32>
    %c0_1 = arith.constant 0 : index
    %c0_2 = arith.constant 0 : index
    %1 = vector.load %arg1[%c0_1, %c0_2] : memref<32x128xf32, #tpu.memory_space<vmem>>, vector<32x128xf32>
    %c0_3 = arith.constant 0 : index
    %c0_4 = arith.constant 0 : index
    %2 = vector.load %arg2[%c0_3, %c0_4] : memref<32x128xf32, #tpu.memory_space<vmem>>, vector<32x128xf32>
    %c0_5 = arith.constant 0 : index
    %c0_6 = arith.constant 0 : index
    %3 = vector.load %arg3[%c0_5, %c0_6] : memref<32x1xf32, #tpu.memory_space<vmem>>, vector<32x1xf32>
    %c0_7 = arith.constant 0 : index
    %c0_8 = arith.constant 0 : index
    %4 = vector.load %arg4[%c0_7, %c0_8] : memref<32x1xf32, #tpu.memory_space<vmem>>, vector<32x1xf32>
    %c0_9 = arith.constant 0 : index
    %c0_10 = arith.constant 0 : index
    %5 = vector.load %arg5[%c0_9, %c0_10] : memref<32x1xf32, #tpu.memory_space<vmem>>, vector<32x1xf32>
    %c0_11 = arith.constant 0 : index
    %c0_12 = arith.constant 0 : index
    %6 = vector.load %arg6[%c0_11, %c0_12] : memref<32x1xf32, #tpu.memory_space<vmem>>, vector<32x1xf32>
    %7 = tpu.iota {dimensions = array<i32: 1>} : vector<1x128xi32>
    %c32_i32 = arith.constant 32 : i32
    %8 = vector.broadcast %c32_i32 : i32 to vector<1x128xi32>
    %9 = arith.cmpi slt, %7, %8 : vector<1x128xi32>
    %10 = arith.extui %9 : vector<1x128xi1> to vector<1x128xi32>
    %11 = arith.sitofp %10 : vector<1x128xi32> to vector<1x128xf32>
    %12 = arith.mulf %0, %1 : vector<32x128xf32>
    %13 = arith.mulf %0, %2 : vector<32x128xf32>
    %cst = arith.constant dense<0.000000e+00> : vector<32xf32>
    %14 = vector.multi_reduction <add>, %12, %cst [1] : vector<32x128xf32> to vector<32xf32>
    %15 = vector.shape_cast %14 : vector<32xf32> to vector<32x1xf32>
    %cst_13 = arith.constant dense<0.000000e+00> : vector<32xf32>
    %16 = vector.multi_reduction <add>, %13, %cst_13 [1] : vector<32x128xf32> to vector<32xf32>
    %17 = vector.shape_cast %16 : vector<32xf32> to vector<32x1xf32>
    %18 = vector.broadcast %11 : vector<1x128xf32> to vector<32x128xf32>
    %19 = arith.mulf %12, %18 : vector<32x128xf32>
    %cst_14 = arith.constant dense<0.000000e+00> : vector<32xf32>
    %20 = vector.multi_reduction <add>, %19, %cst_14 [1] : vector<32x128xf32> to vector<32xf32>
    %21 = vector.shape_cast %20 : vector<32xf32> to vector<32x1xf32>
    %22 = vector.broadcast %11 : vector<1x128xf32> to vector<32x128xf32>
    %23 = arith.mulf %13, %22 : vector<32x128xf32>
    %cst_15 = arith.constant dense<0.000000e+00> : vector<32xf32>
    %24 = vector.multi_reduction <add>, %23, %cst_15 [1] : vector<32x128xf32> to vector<32xf32>
    %25 = vector.shape_cast %24 : vector<32xf32> to vector<32x1xf32>
    %26 = arith.subf %15, %21 : vector<32x1xf32>
    %27 = arith.subf %17, %25 : vector<32x1xf32>
    %28 = arith.subf %21, %25 : vector<32x1xf32>
    %cst_16 = arith.constant 0.000000e+00 : f32
    %29 = vector.broadcast %cst_16 : f32 to vector<32x1xf32>
    %30 = arith.minimumf %28, %29 : vector<32x1xf32>
    %31 = math.absf %28 : vector<32x1xf32>
    %cst_17 = arith.constant 0.000000e+00 : f32
    %32 = vector.broadcast %cst_17 : f32 to vector<32x1xf32>
    %33 = arith.subf %32, %31 : vector<32x1xf32>
    %34 = math.exp %33 : vector<32x1xf32>
    %cst_18 = arith.constant 1.000000e+00 : f32
    %35 = vector.broadcast %cst_18 : f32 to vector<32x1xf32>
    %36 = arith.addf %35, %34 : vector<32x1xf32>
    %37 = math.log %36 : vector<32x1xf32>
    %38 = arith.subf %30, %37 : vector<32x1xf32>
    %39 = arith.mulf %3, %38 : vector<32x1xf32>
    %40 = vector.shape_cast %39 : vector<32x1xf32> to vector<1x32x1xf32>
    %cst_19 = arith.constant dense<0.000000e+00> : vector<1xf32>
    %41 = vector.multi_reduction <add>, %40, %cst_19 [1, 2] : vector<1x32x1xf32> to vector<1xf32>
    %42 = vector.shape_cast %41 : vector<1xf32> to vector<1x1x1xf32>
    %43 = vector.extract %42[0, 0, 0] : f32 from vector<1x1x1xf32>
    %cst_20 = arith.constant 3.200000e+01 : f32
    %44 = arith.divf %43, %cst_20 : f32
    %cst_21 = arith.constant 0.000000e+00 : f32
    %45 = arith.subf %cst_21, %44 : f32
    %46 = arith.subf %27, %26 : vector<32x1xf32>
    %cst_22 = arith.constant 0.000000e+00 : f32
    %47 = vector.broadcast %cst_22 : f32 to vector<32x1xf32>
    %48 = arith.minimumf %46, %47 : vector<32x1xf32>
    %49 = math.absf %46 : vector<32x1xf32>
    %cst_23 = arith.constant 0.000000e+00 : f32
    %50 = vector.broadcast %cst_23 : f32 to vector<32x1xf32>
    %51 = arith.subf %50, %49 : vector<32x1xf32>
    %52 = math.exp %51 : vector<32x1xf32>
    %cst_24 = arith.constant 1.000000e+00 : f32
    %53 = vector.broadcast %cst_24 : f32 to vector<32x1xf32>
    %54 = arith.addf %53, %52 : vector<32x1xf32>
    %55 = math.log %54 : vector<32x1xf32>
    %56 = arith.subf %48, %55 : vector<32x1xf32>
    %57 = arith.mulf %3, %56 : vector<32x1xf32>
    %58 = vector.shape_cast %57 : vector<32x1xf32> to vector<1x32x1xf32>
    %cst_25 = arith.constant dense<0.000000e+00> : vector<1xf32>
    %59 = vector.multi_reduction <add>, %58, %cst_25 [1, 2] : vector<1x32x1xf32> to vector<1xf32>
    %60 = vector.shape_cast %59 : vector<1xf32> to vector<1x1x1xf32>
    %61 = vector.extract %60[0, 0, 0] : f32 from vector<1x1x1xf32>
    %cst_26 = arith.constant 3.200000e+01 : f32
    %62 = arith.divf %61, %cst_26 : f32
    %cst_27 = arith.constant 0.000000e+00 : f32
    %63 = arith.subf %cst_27, %62 : f32
    %cst_28 = arith.constant 1.000000e+00 : f32
    %64 = vector.broadcast %cst_28 : f32 to vector<32x1xf32>
    %65 = arith.subf %64, %3 : vector<32x1xf32>
    %66 = arith.subf %26, %27 : vector<32x1xf32>
    %cst_29 = arith.constant 0.000000e+00 : f32
    %67 = vector.broadcast %cst_29 : f32 to vector<32x1xf32>
    %68 = arith.minimumf %66, %67 : vector<32x1xf32>
    %69 = math.absf %66 : vector<32x1xf32>
    %cst_30 = arith.constant 0.000000e+00 : f32
    %70 = vector.broadcast %cst_30 : f32 to vector<32x1xf32>
    %71 = arith.subf %70, %69 : vector<32x1xf32>
    %72 = math.exp %71 : vector<32x1xf32>
    %cst_31 = arith.constant 1.000000e+00 : f32
    %73 = vector.broadcast %cst_31 : f32 to vector<32x1xf32>
    %74 = arith.addf %73, %72 : vector<32x1xf32>
    %75 = math.log %74 : vector<32x1xf32>
    %76 = arith.subf %68, %75 : vector<32x1xf32>
    %77 = arith.mulf %65, %76 : vector<32x1xf32>
    %78 = vector.shape_cast %77 : vector<32x1xf32> to vector<1x32x1xf32>
    %cst_32 = arith.constant dense<0.000000e+00> : vector<1xf32>
    %79 = vector.multi_reduction <add>, %78, %cst_32 [1, 2] : vector<1x32x1xf32> to vector<1xf32>
    %80 = vector.shape_cast %79 : vector<1xf32> to vector<1x1x1xf32>
    %81 = vector.extract %80[0, 0, 0] : f32 from vector<1x1x1xf32>
    %cst_33 = arith.constant 3.200000e+01 : f32
    %82 = arith.divf %81, %cst_33 : f32
    %83 = arith.subf %63, %82 : f32
    %84 = arith.subf %15, %17 : vector<32x1xf32>
    %cst_34 = arith.constant 0.000000e+00 : f32
    %85 = vector.broadcast %cst_34 : f32 to vector<32x1xf32>
    %86 = arith.minimumf %84, %85 : vector<32x1xf32>
    %87 = math.absf %84 : vector<32x1xf32>
    %cst_35 = arith.constant 0.000000e+00 : f32
    %88 = vector.broadcast %cst_35 : f32 to vector<32x1xf32>
    %89 = arith.subf %88, %87 : vector<32x1xf32>
    %90 = math.exp %89 : vector<32x1xf32>
    %cst_36 = arith.constant 1.000000e+00 : f32
    %91 = vector.broadcast %cst_36 : f32 to vector<32x1xf32>
    %92 = arith.addf %91, %90 : vector<32x1xf32>
    %93 = math.log %92 : vector<32x1xf32>
    %94 = arith.subf %86, %93 : vector<32x1xf32>
    %95 = vector.shape_cast %94 : vector<32x1xf32> to vector<1x32x1xf32>
    %cst_37 = arith.constant dense<0.000000e+00> : vector<1xf32>
    %96 = vector.multi_reduction <add>, %95, %cst_37 [1, 2] : vector<1x32x1xf32> to vector<1xf32>
    %97 = vector.shape_cast %96 : vector<1xf32> to vector<1x1x1xf32>
    %98 = vector.extract %97[0, 0, 0] : f32 from vector<1x1x1xf32>
    %cst_38 = arith.constant 3.200000e+01 : f32
    %99 = arith.divf %98, %cst_38 : f32
    %cst_39 = arith.constant 0.000000e+00 : f32
    %100 = arith.subf %cst_39, %99 : f32
    %101 = vector.shape_cast %4 : vector<32x1xf32> to vector<1x32x1xf32>
    %cst_40 = arith.constant dense<0.000000e+00> : vector<1xf32>
    %102 = vector.multi_reduction <add>, %101, %cst_40 [1, 2] : vector<1x32x1xf32> to vector<1xf32>
    %103 = vector.shape_cast %102 : vector<1xf32> to vector<1x1x1xf32>
    %104 = vector.extract %103[0, 0, 0] : f32 from vector<1x1x1xf32>
    %105 = vector.shape_cast %5 : vector<32x1xf32> to vector<1x32x1xf32>
    %cst_41 = arith.constant dense<0.000000e+00> : vector<1xf32>
    %106 = vector.multi_reduction <add>, %105, %cst_41 [1, 2] : vector<1x32x1xf32> to vector<1xf32>
    %107 = vector.shape_cast %106 : vector<1xf32> to vector<1x1x1xf32>
    %108 = vector.extract %107[0, 0, 0] : f32 from vector<1x1x1xf32>
    %109 = arith.addf %104, %108 : f32
    %110 = vector.shape_cast %6 : vector<32x1xf32> to vector<1x32x1xf32>
    %cst_42 = arith.constant dense<0.000000e+00> : vector<1xf32>
    %111 = vector.multi_reduction <add>, %110, %cst_42 [1, 2] : vector<1x32x1xf32> to vector<1xf32>
    %112 = vector.shape_cast %111 : vector<1xf32> to vector<1x1x1xf32>
    %113 = vector.extract %112[0, 0, 0] : f32 from vector<1x1x1xf32>
    %114 = vector.extract_strided_slice %1 {offsets = [0, 0], sizes = [32, 32], strides = [1, 1]} : vector<32x128xf32> to vector<32x32xf32>
    %115 = vector.extract_strided_slice %1 {offsets = [0, 32], sizes = [32, 32], strides = [1, 1]} : vector<32x128xf32> to vector<32x32xf32>
    %116 = arith.subf %114, %115 : vector<32x32xf32>
    %117 = arith.mulf %116, %116 : vector<32x32xf32>
    %cst_43 = arith.constant dense<0.000000e+00> : vector<32xf32>
    %118 = vector.multi_reduction <add>, %117, %cst_43 [1] : vector<32x32xf32> to vector<32xf32>
    %119 = vector.shape_cast %118 : vector<32xf32> to vector<32x1xf32>
    %120 = arith.mulf %4, %119 : vector<32x1xf32>
    %121 = vector.shape_cast %120 : vector<32x1xf32> to vector<1x32x1xf32>
    %cst_44 = arith.constant dense<0.000000e+00> : vector<1xf32>
    %122 = vector.multi_reduction <add>, %121, %cst_44 [1, 2] : vector<1x32x1xf32> to vector<1xf32>
    %123 = vector.shape_cast %122 : vector<1xf32> to vector<1x1x1xf32>
    %124 = vector.extract %123[0, 0, 0] : f32 from vector<1x1x1xf32>
    %125 = vector.extract_strided_slice %2 {offsets = [0, 0], sizes = [32, 32], strides = [1, 1]} : vector<32x128xf32> to vector<32x32xf32>
    %126 = vector.extract_strided_slice %2 {offsets = [0, 32], sizes = [32, 32], strides = [1, 1]} : vector<32x128xf32> to vector<32x32xf32>
    %127 = arith.subf %125, %126 : vector<32x32xf32>
    %128 = arith.mulf %127, %127 : vector<32x32xf32>
    %cst_45 = arith.constant dense<0.000000e+00> : vector<32xf32>
    %129 = vector.multi_reduction <add>, %128, %cst_45 [1] : vector<32x32xf32> to vector<32xf32>
    %130 = vector.shape_cast %129 : vector<32xf32> to vector<32x1xf32>
    %131 = arith.mulf %5, %130 : vector<32x1xf32>
    %132 = vector.shape_cast %131 : vector<32x1xf32> to vector<1x32x1xf32>
    %cst_46 = arith.constant dense<0.000000e+00> : vector<1xf32>
    %133 = vector.multi_reduction <add>, %132, %cst_46 [1, 2] : vector<1x32x1xf32> to vector<1xf32>
    %134 = vector.shape_cast %133 : vector<1xf32> to vector<1x1x1xf32>
    %135 = vector.extract %134[0, 0, 0] : f32 from vector<1x1x1xf32>
    %136 = arith.addf %124, %135 : f32
    %cst_47 = arith.constant 3.200000e+01 : f32
    %137 = arith.mulf %109, %cst_47 : f32
    %138 = arith.divf %136, %137 : f32
    %139 = vector.extract_strided_slice %0 {offsets = [0, 0], sizes = [32, 32], strides = [1, 1]} : vector<32x128xf32> to vector<32x32xf32>
    %140 = vector.extract_strided_slice %0 {offsets = [0, 32], sizes = [32, 32], strides = [1, 1]} : vector<32x128xf32> to vector<32x32xf32>
    %141 = arith.subf %139, %140 : vector<32x32xf32>
    %142 = arith.mulf %141, %141 : vector<32x32xf32>
    %cst_48 = arith.constant dense<0.000000e+00> : vector<32xf32>
    %143 = vector.multi_reduction <add>, %142, %cst_48 [1] : vector<32x32xf32> to vector<32xf32>
    %144 = vector.shape_cast %143 : vector<32xf32> to vector<32x1xf32>
    %145 = arith.mulf %6, %144 : vector<32x1xf32>
    %146 = vector.shape_cast %145 : vector<32x1xf32> to vector<1x32x1xf32>
    %cst_49 = arith.constant dense<0.000000e+00> : vector<1xf32>
    %147 = vector.multi_reduction <add>, %146, %cst_49 [1, 2] : vector<1x32x1xf32> to vector<1xf32>
    %148 = vector.shape_cast %147 : vector<1xf32> to vector<1x1x1xf32>
    %149 = vector.extract %148[0, 0, 0] : f32 from vector<1x1x1xf32>
    %cst_50 = arith.constant 3.200000e+01 : f32
    %150 = arith.mulf %113, %cst_50 : f32
    %151 = arith.divf %149, %150 : f32
    %152 = arith.addf %138, %151 : f32
    %cst_51 = arith.constant 5.000000e-01 : f32
    %153 = arith.mulf %cst_51, %45 : f32
    %cst_52 = arith.constant 5.000000e-01 : f32
    %154 = arith.mulf %cst_52, %83 : f32
    %155 = arith.addf %153, %154 : f32
    %156 = arith.addf %155, %100 : f32
    %cst_53 = arith.constant 1.000000e-01 : f32
    %157 = arith.mulf %cst_53, %152 : f32
    %158 = arith.subf %156, %157 : f32
    %c0_54 = arith.constant 0 : index
    %159 = memref.load %arg7[%c0_54] : memref<1xf32, #tpu.memory_space<smem>>
    memref.store %158, %arg7[%c0_54] : memref<1xf32, #tpu.memory_space<smem>>
    return
  }
}

</mosaic_0001>

<bundles_post_ra>
// kernel: _lgndice_forward.3
= control target key start
LH: loop header
LB: loop body
LE: loop exit
PB: predicated region body
PF: predicated region fallthrough
CT: control target
= control target key end

     0   :  { %s585_s1 = inlined_call_operand.vmem [shape: f32[128,128], index: 1, kind: input, shape index: {}, may-alias: {1,2}]   ;;  %s586_s0 = inlined_call_operand.vmem [shape: f32[128,128], index: 0, kind: input, shape index: {}]   ;;  %s587_s2 = inlined_call_operand.vmem [shape: f32[128,128], index: 2, kind: input, shape index: {}, may-alias: {1,2}]   ;;  %s588_s3 = inlined_call_operand.vmem [shape: f32[128,128], index: 3, kind: output, shape index: {0}]   ;;  %s589_s4 = inlined_call_operand.vmem [shape: f32[128,128], index: 4, kind: output, shape index: {1}]  }
   0x1   :  { %v83_v0 = vld [vmem:[%s585_s1 + $0x78] sm:$0xff]  ;;  %v82_v1 = vld [vmem:[%s585_s1 + $0x70] sm:$0xff]  ;;  %v81_v2 = vld [vmem:[%s585_s1 + $0x68] sm:$0xff] }
   0x2   :  { %273 = vmatpush.msra.mxu2 %v83_v0  ;;  %274 = vmatpush.msra.mxu3 %v83_v0  ;;  %v80_v3 = vld [vmem:[%s585_s1 + $0x60] sm:$0xff]  ;;  %v79_v4 = vld [vmem:[%s585_s1 + $0x58] sm:$0xff]  ;;  %v78_v5 = vld [vmem:[%s585_s1 + $0x50] sm:$0xff] }
   0x3   :  { %84 = vmatpush.msra.mxu0 %v83_v0  ;;  %272 = vmatpush.msra.mxu1 %v83_v0  ;;  %v77_v6 = vld [vmem:[%s585_s1 + $0x48] sm:$0xff]  ;;  %v76_v7 = vld [vmem:[%s585_s1 + $0x40] sm:$0xff]  ;;  %v75_v8 = vld [vmem:[%s585_s1 + $0x38] sm:$0xff] }
   0x4   :  { %276 = vmatpush.msra.mxu2 %v82_v1  ;;  %277 = vmatpush.msra.mxu3 %v82_v1  ;;  %v74_v9 = vld [vmem:[%s585_s1 + $0x30] sm:$0xff]  ;;  %v73_v10 = vld [vmem:[%s585_s1 + $0x28] sm:$0xff]  ;;  %v72_v11 = vld [vmem:[%s585_s1 + $0x20] sm:$0xff] }
   0x5   :  { %85 = vmatpush.msra.mxu0 %v82_v1  ;;  %275 = vmatpush.msra.mxu1 %v82_v1  ;;  %v71_v12 = vld [vmem:[%s585_s1 + $0x18] sm:$0xff]  ;;  %v70_v13 = vld [vmem:[%s585_s1 + $0x10] sm:$0xff]  ;;  %v69_v14 = vld [vmem:[%s585_s1 + $0x8] sm:$0xff] }
   0x6   :  { %279 = vmatpush.msra.mxu2 %v81_v2  ;;  %280 = vmatpush.msra.mxu3 %v81_v2  ;;  %v68_v15 = vld [vmem:[%s585_s1] sm:$0xff]  ;;  %v61_v20 = vld [vmem:[%s586_s0 + $0x48] sm:$0xff]  ;;  %v62_v24 = vld [vmem:[%s586_s0 + $0x50] sm:$0xff] }
   0x7   :  { %86 = vmatpush.msra.mxu0 %v81_v2  ;;  %278 = vmatpush.msra.mxu1 %v81_v2  ;;  %v60_v16 = vld [vmem:[%s586_s0 + $0x40] sm:$0xff]  ;;  %v65_v21 = vld [vmem:[%s586_s0 + $0x68] sm:$0xff]  ;;  %v66_v25 = vld [vmem:[%s586_s0 + $0x70] sm:$0xff] }
   0x8   :  { %282 = vmatpush.msra.mxu2 %v80_v3  ;;  %283 = vmatpush.msra.mxu3 %v80_v3  ;;  %v64_v17 = vld [vmem:[%s586_s0 + $0x60] sm:$0xff]  ;;  %v53_v22 = vld [vmem:[%s586_s0 + $0x8] sm:$0xff]  ;;  %v54_v26 = vld [vmem:[%s586_s0 + $0x10] sm:$0xff] }
   0x9   :  { %87 = vmatpush.msra.mxu0 %v80_v3  ;;  %281 = vmatpush.msra.mxu1 %v80_v3  ;;  %v52_v18 = vld [vmem:[%s586_s0] sm:$0xff]  ;;  %v57_v23 = vld [vmem:[%s586_s0 + $0x28] sm:$0xff]  ;;  %v58_v27 = vld [vmem:[%s586_s0 + $0x30] sm:$0xff] }
   0xa   :  { %285 = vmatpush.msra.mxu2 %v79_v4  ;;  %286 = vmatpush.msra.mxu3 %v79_v4  ;;  %v56_v19 = vld [vmem:[%s586_s0 + $0x20] sm:$0xff]  ;;  %v63_v28 = vld [vmem:[%s586_s0 + $0x58] sm:$0xff]  ;;  %v217_v44 = vld [vmem:[%s587_s2 + $0x8] sm:$0xff] }
   0xb   :  { %88 = vmatpush.msra.mxu0 %v79_v4  ;;  %284 = vmatpush.msra.mxu1 %v79_v4  ;;  %v67_v29 = vld [vmem:[%s586_s0 + $0x78] sm:$0xff]  ;;  %v216_v32 = vld [vmem:[%s587_s2] sm:$0xff]  ;;  %v221_v45 = vld [vmem:[%s587_s2 + $0x28] sm:$0xff] }
   0xc   :  { %288 = vmatpush.msra.mxu2 %v78_v5  ;;  %289 = vmatpush.msra.mxu3 %v78_v5  ;;  %v55_v30 = vld [vmem:[%s586_s0 + $0x18] sm:$0xff]  ;;  %v220_v33 = vld [vmem:[%s587_s2 + $0x20] sm:$0xff]  ;;  %v225_v50 = vld [vmem:[%s587_s2 + $0x48] sm:$0xff] }
   0xd   :  { %89 = vmatpush.msra.mxu0 %v78_v5  ;;  %287 = vmatpush.msra.mxu1 %v78_v5  ;;  %v59_v31 = vld [vmem:[%s586_s0 + $0x38] sm:$0xff]  ;;  %v224_v38 = vld [vmem:[%s587_s2 + $0x40] sm:$0xff]  ;;  %v229_v51 = vld [vmem:[%s587_s2 + $0x68] sm:$0xff] }
   0xe   :  { %291 = vmatpush.msra.mxu2 %v77_v6  ;;  %292 = vmatpush.msra.mxu3 %v77_v6  ;;  %v228_v39 = vld [vmem:[%s587_s2 + $0x60] sm:$0xff]  ;;  %v218_v56 = vld [vmem:[%s587_s2 + $0x10] sm:$0xff]  ;;  %v219_v4 = vld [vmem:[%s587_s2 + $0x18] sm:$0xff] }
   0xf   :  { %90 = vmatpush.msra.mxu0 %v77_v6  ;;  %290 = vmatpush.msra.mxu1 %v77_v6  ;;  %v222_v57 = vld [vmem:[%s587_s2 + $0x30] sm:$0xff]  ;;  %v223_v5 = vld [vmem:[%s587_s2 + $0x38] sm:$0xff] }
  0x10   :  { %294 = vmatpush.msra.mxu2 %v76_v7  ;;  %295 = vmatpush.msra.mxu3 %v76_v7  ;;  %v226_v62 = vld [vmem:[%s587_s2 + $0x50] sm:$0xff] }
  0x11   :  { %91 = vmatpush.msra.mxu0 %v76_v7  ;;  %293 = vmatpush.msra.mxu1 %v76_v7  ;;  %v230_v63 = vld [vmem:[%s587_s2 + $0x70] sm:$0xff] }
  0x12   :  { %297 = vmatpush.msra.mxu2 %v75_v8  ;;  %298 = vmatpush.msra.mxu3 %v75_v8 }
  0x13   :  { %92 = vmatpush.msra.mxu0 %v75_v8  ;;  %296 = vmatpush.msra.mxu1 %v75_v8 }
  0x14   :  { %300 = vmatpush.msra.mxu2 %v74_v9  ;;  %301 = vmatpush.msra.mxu3 %v74_v9 }
  0x15   :  { %93 = vmatpush.msra.mxu0 %v74_v9  ;;  %299 = vmatpush.msra.mxu1 %v74_v9 }
  0x16   :  { %303 = vmatpush.msra.mxu2 %v73_v10  ;;  %304 = vmatpush.msra.mxu3 %v73_v10 }
  0x17   :  { %94 = vmatpush.msra.mxu0 %v73_v10  ;;  %302 = vmatpush.msra.mxu1 %v73_v10  ;;  %v227_v10 = vld [vmem:[%s587_s2 + $0x58] sm:$0xff] }
  0x18   :  { %306 = vmatpush.msra.mxu2 %v72_v11  ;;  %307 = vmatpush.msra.mxu3 %v72_v11 }
  0x19   :  { %95 = vmatpush.msra.mxu0 %v72_v11  ;;  %305 = vmatpush.msra.mxu1 %v72_v11  ;;  %v231_v11 = vld [vmem:[%s587_s2 + $0x78] sm:$0xff] }
  0x1a   :  { %309 = vmatpush.msra.mxu2 %v71_v12  ;;  %310 = vmatpush.msra.mxu3 %v71_v12 }
  0x1b   :  { %96 = vmatpush.msra.mxu0 %v71_v12  ;;  %308 = vmatpush.msra.mxu1 %v71_v12 }
  0x1c   :  { %312 = vmatpush.msra.mxu2 %v70_v13  ;;  %313 = vmatpush.msra.mxu3 %v70_v13 }
  0x1d   :  { %97 = vmatpush.msra.mxu0 %v70_v13  ;;  %311 = vmatpush.msra.mxu1 %v70_v13 }
  0x1e   :  { %315 = vmatpush.msra.mxu2 %v69_v14  ;;  %316 = vmatpush.msra.mxu3 %v69_v14 }
  0x1f   :  { %98 = vmatpush.msra.mxu0 %v69_v14  ;;  %314 = vmatpush.msra.mxu1 %v69_v14 }
  0x20   :  { %318 = vmatpush.msra.mxu2 %v68_v15  ;;  %319 = vmatpush.msra.mxu3 %v68_v15 }
  0x21   :  { %124 = vmatmul.f32.vlgmr.msra.gmra.mxu2 %v60_v16  ;;  %136 = vmatmul.f32.vlgmr.msra.gmra.mxu3 %v64_v17 }
  0x22   :  { %99 = vmatpush.msra.mxu0 %v68_v15  ;;  %317 = vmatpush.msra.mxu1 %v68_v15 }
  0x23   :  { %100 = vmatmul.f32.vlgmr.msra.gmra.mxu0 %v52_v18  ;;  %112 = vmatmul.f32.vlgmr.msra.gmra.mxu1 %v56_v19 }
  0x29   :  { %127 = vmatmul.f32.gmra.mxu2 %v61_v20  ;;  %139 = vmatmul.f32.gmra.mxu3 %v65_v21 }
  0x2b   :  { %103 = vmatmul.f32.gmra.mxu0 %v53_v22  ;;  %115 = vmatmul.f32.gmra.mxu1 %v57_v23 }
  0x31   :  { %130 = vmatmul.f32.gmra.mxu2 %v62_v24  ;;  %142 = vmatmul.f32.gmra.mxu3 %v66_v25 }
  0x33   :  { %106 = vmatmul.f32.gmra.mxu0 %v54_v26  ;;  %118 = vmatmul.f32.gmra.mxu1 %v58_v27 }
  0x39   :  { %133 = vmatmul.f32.gmra.mxu2 %v63_v28  ;;  %145 = vmatmul.f32.gmra.mxu3 %v67_v29 }
  0x3b   :  { %109 = vmatmul.f32.gmra.mxu0 %v55_v30  ;;  %121 = vmatmul.f32.gmra.mxu1 %v59_v31 }
  0xa0   :  { %v101_v34 = vpop.f32.mrf.mxu0  ;;  %v113_v35 = vpop.f32.mrf.mxu1 }
  0xa1   :  { %200 = vst [vmem:[%s588_s3] sm:$0xff] %v101_v34  ;;  %v232_v36 = vadd.f32 %v216_v32, %v101_v34  ;;  %v236_v37 = vadd.f32 %v220_v33, %v113_v35 }
  0xa2   :  { %204 = vst [vmem:[%s588_s3 + $0x20] sm:$0xff] %v113_v35 }
  0xa3   :  { %248 = vst [vmem:[%s589_s4] sm:$0xff] %v232_v36 }
  0xa4   :  { %252 = vst [vmem:[%s589_s4 + $0x20] sm:$0xff] %v236_v37  ;;  %v125_v40 = vpop.f32.mrf.mxu2  ;;  %v137_v41 = vpop.f32.mrf.mxu3 }
  0xa5   :  { %208 = vst [vmem:[%s588_s3 + $0x40] sm:$0xff] %v125_v40  ;;  %v240_v42 = vadd.f32 %v224_v38, %v125_v40  ;;  %v244_v43 = vadd.f32 %v228_v39, %v137_v41 }
  0xa6   :  { %212 = vst [vmem:[%s588_s3 + $0x60] sm:$0xff] %v137_v41 }
  0xa7   :  { %256 = vst [vmem:[%s589_s4 + $0x40] sm:$0xff] %v240_v42 }
  0xa8   :  { %260 = vst [vmem:[%s589_s4 + $0x60] sm:$0xff] %v244_v43  ;;  %v104_v46 = vpop.f32.mrf.mxu0  ;;  %v116_v47 = vpop.f32.mrf.mxu1 }
  0xa9   :  { %201 = vst [vmem:[%s588_s3 + $0x8] sm:$0xff] %v104_v46  ;;  %v233_v48 = vadd.f32 %v217_v44, %v104_v46  ;;  %v237_v49 = vadd.f32 %v221_v45, %v116_v47 }
  0xaa   :  { %205 = vst [vmem:[%s588_s3 + $0x28] sm:$0xff] %v116_v47 }
  0xab   :  { %249 = vst [vmem:[%s589_s4 + $0x8] sm:$0xff] %v233_v48 }
  0xac   :  { %253 = vst [vmem:[%s589_s4 + $0x28] sm:$0xff] %v237_v49  ;;  %v128_v52 = vpop.f32.mrf.mxu2  ;;  %v140_v53 = vpop.f32.mrf.mxu3 }
  0xad   :  { %209 = vst [vmem:[%s588_s3 + $0x48] sm:$0xff] %v128_v52  ;;  %v241_v54 = vadd.f32 %v225_v50, %v128_v52  ;;  %v245_v55 = vadd.f32 %v229_v51, %v140_v53 }
  0xae   :  { %213 = vst [vmem:[%s588_s3 + $0x68] sm:$0xff] %v140_v53 }
  0xaf   :  { %257 = vst [vmem:[%s589_s4 + $0x48] sm:$0xff] %v241_v54 }
  0xb0   :  { %261 = vst [vmem:[%s589_s4 + $0x68] sm:$0xff] %v245_v55  ;;  %v107_v58 = vpop.f32.mrf.mxu0  ;;  %v119_v59 = vpop.f32.mrf.mxu1 }
  0xb1   :  { %202 = vst [vmem:[%s588_s3 + $0x10] sm:$0xff] %v107_v58  ;;  %v234_v60 = vadd.f32 %v218_v56, %v107_v58  ;;  %v238_v61 = vadd.f32 %v222_v57, %v119_v59 }
  0xb2   :  { %206 = vst [vmem:[%s588_s3 + $0x30] sm:$0xff] %v119_v59 }
  0xb3   :  { %250 = vst [vmem:[%s589_s4 + $0x10] sm:$0xff] %v234_v60 }
  0xb4   :  { %254 = vst [vmem:[%s589_s4 + $0x30] sm:$0xff] %v238_v61  ;;  %v131_v0 = vpop.f32.mrf.mxu2  ;;  %v143_v1 = vpop.f32.mrf.mxu3 }
  0xb5   :  { %210 = vst [vmem:[%s588_s3 + $0x50] sm:$0xff] %v131_v0  ;;  %v242_v2 = vadd.f32 %v226_v62, %v131_v0  ;;  %v246_v3 = vadd.f32 %v230_v63, %v143_v1 }
  0xb6   :  { %214 = vst [vmem:[%s588_s3 + $0x70] sm:$0xff] %v143_v1 }
  0xb7   :  { %258 = vst [vmem:[%s589_s4 + $0x50] sm:$0xff] %v242_v2 }
  0xb8   :  { %262 = vst [vmem:[%s589_s4 + $0x70] sm:$0xff] %v246_v3  ;;  %v110_v6 = vpop.f32.mrf.mxu0  ;;  %v122_v7 = vpop.f32.mrf.mxu1 }
  0xb9   :  { %203 = vst [vmem:[%s588_s3 + $0x18] sm:$0xff] %v110_v6  ;;  %v235_v8 = vadd.f32 %v219_v4, %v110_v6  ;;  %v239_v9 = vadd.f32 %v223_v5, %v122_v7 }
  0xba   :  { %207 = vst [vmem:[%s588_s3 + $0x38] sm:$0xff] %v122_v7 }
  0xbb   :  { %251 = vst [vmem:[%s589_s4 + $0x18] sm:$0xff] %v235_v8 }
  0xbc   :  { %255 = vst [vmem:[%s589_s4 + $0x38] sm:$0xff] %v239_v9  ;;  %v134_v12 = vpop.f32.mrf.mxu2  ;;  %v146_v13 = vpop.f32.mrf.mxu3 }
  0xbd   :  { %211 = vst [vmem:[%s588_s3 + $0x58] sm:$0xff] %v134_v12  ;;  %v243_v14 = vadd.f32 %v227_v10, %v134_v12  ;;  %v247_v15 = vadd.f32 %v231_v11, %v146_v13 }
  0xbe   :  { %215 = vst [vmem:[%s588_s3 + $0x78] sm:$0xff] %v146_v13 }
  0xbf   :  { %259 = vst [vmem:[%s589_s4 + $0x58] sm:$0xff] %v243_v14 }
  0xc0   :  { %263 = vst [vmem:[%s589_s4 + $0x78] sm:$0xff] %v247_v15 }

// kernel: _lgndice_forward.4
= control target key start
LH: loop header
LB: loop body
LE: loop exit
PB: predicated region body
PF: predicated region fallthrough
CT: control target
= control target key end

     0   :  { %s587_s0 = inlined_call_operand.vmem [shape: f32[128,128], index: 0, kind: input, shape index: {}]   ;;  %s588_s1 = inlined_call_operand.vmem [shape: f32[128,128], index: 1, kind: input, shape index: {}]   ;;  %s589_s2 = inlined_call_operand.vmem [shape: f32[128,128], index: 2, kind: input, shape index: {}]   ;;  %s590_s3 = inlined_call_operand.hbm [shape: f32[128,128], index: 3, kind: output, shape index: {0}]   ;;  %s591_s4 = inlined_call_operand.vmem [shape: f32[128,128], index: 4, kind: output, shape index: {1}]  }
   0x1   :  { %v84_v0 = vld [vmem:[%s588_s1 + $0x78] sm:$0xff]  ;;  %v83_v1 = vld [vmem:[%s588_s1 + $0x70] sm:$0xff]  ;;  %v82_v2 = vld [vmem:[%s588_s1 + $0x68] sm:$0xff] }
   0x2   :  { %288 = vmatpush.msra.mxu2 %v84_v0  ;;  %289 = vmatpush.msra.mxu3 %v84_v0  ;;  %v81_v3 = vld [vmem:[%s588_s1 + $0x60] sm:$0xff]  ;;  %v80_v4 = vld [vmem:[%s588_s1 + $0x58] sm:$0xff] }
   0x3   :  { %85 = vmatpush.msra.mxu0 %v84_v0  ;;  %287 = vmatpush.msra.mxu1 %v84_v0 }
   0x4   :  { %291 = vmatpush.msra.mxu2 %v83_v1  ;;  %292 = vmatpush.msra.mxu3 %v83_v1 }
   0x5   :  { %86 = vmatpush.msra.mxu0 %v83_v1  ;;  %290 = vmatpush.msra.mxu1 %v83_v1 }
   0x6   :  { %294 = vmatpush.msra.mxu2 %v82_v2  ;;  %295 = vmatpush.msra.mxu3 %v82_v2 }
   0x7   :  { %87 = vmatpush.msra.mxu0 %v82_v2  ;;  %293 = vmatpush.msra.mxu1 %v82_v2 }
   0x8   :  { %297 = vmatpush.msra.mxu2 %v81_v3  ;;  %298 = vmatpush.msra.mxu3 %v81_v3 }
   0x9   :  { %10 = vsyncpa [#allocation4], 0  ;;  %v79_v5 = vld [vmem:[%s588_s1 + $0x50] sm:$0xff]  ;;  %88 = vmatpush.msra.mxu0 %v81_v3  ;;  %296 = vmatpush.msra.mxu1 %v81_v3  ;;  %v78_v6 = vld [vmem:[%s588_s1 + $0x48] sm:$0xff]  ;;  %s364_s26 = smov [#allocation3]   ;;  %s271_s29 = sshll.u32 %s590_s3, 4  ;;  %s272_s29 = int_to_ptr.hbm [resolvable:$true] %s271_s29 }
   0xa   :  { %300 = vmatpush.msra.mxu2 %v80_v4  ;;  %301 = vmatpush.msra.mxu3 %v80_v4  ;;  %v77_v7 = vld [vmem:[%s588_s1 + $0x40] sm:$0xff]  ;;  %v76_v8 = vld [vmem:[%s588_s1 + $0x38] sm:$0xff]  ;;  %v75_v9 = vld [vmem:[%s588_s1 + $0x30] sm:$0xff]  ;;  %s365_s9 = smov 128   ;;  %s366_s10 = smov 8  }
   0xb   :  { %89 = vmatpush.msra.mxu0 %v80_v4  ;;  %299 = vmatpush.msra.mxu1 %v80_v4  ;;  %v74_v10 = vld [vmem:[%s588_s1 + $0x28] sm:$0xff]  ;;  %v73_v11 = vld [vmem:[%s588_s1 + $0x20] sm:$0xff]  ;;  %v72_v12 = vld [vmem:[%s588_s1 + $0x18] sm:$0xff] }
   0xc   :  { %303 = vmatpush.msra.mxu2 %v79_v5  ;;  %304 = vmatpush.msra.mxu3 %v79_v5  ;;  %v71_v13 = vld [vmem:[%s588_s1 + $0x10] sm:$0xff]  ;;  %v70_v14 = vld [vmem:[%s588_s1 + $0x8] sm:$0xff]  ;;  %v69_v15 = vld [vmem:[%s588_s1] sm:$0xff]  ;;  %s269_s1 = sshll.u32 %s364_s26, 4  ;;  %s270_s1 = int_to_ptr.vmem [resolvable:$true] %s269_s1 }
   0xd   :  { %90 = vmatpush.msra.mxu0 %v79_v5  ;;  %302 = vmatpush.msra.mxu1 %v79_v5  ;;  %v61_v16 = vld [vmem:[%s587_s0 + $0x40] sm:$0xff]  ;;  %v62_v20 = vld [vmem:[%s587_s0 + $0x48] sm:$0xff]  ;;  %v63_v24 = vld [vmem:[%s587_s0 + $0x50] sm:$0xff] }
   0xe   :  { %306 = vmatpush.msra.mxu2 %v78_v6  ;;  %307 = vmatpush.msra.mxu3 %v78_v6  ;;  %v65_v17 = vld [vmem:[%s587_s0 + $0x60] sm:$0xff]  ;;  %v66_v21 = vld [vmem:[%s587_s0 + $0x68] sm:$0xff]  ;;  %v67_v25 = vld [vmem:[%s587_s0 + $0x70] sm:$0xff] }
   0xf   :  { %91 = vmatpush.msra.mxu0 %v78_v6  ;;  %305 = vmatpush.msra.mxu1 %v78_v6  ;;  %v53_v18 = vld [vmem:[%s587_s0] sm:$0xff]  ;;  %v54_v22 = vld [vmem:[%s587_s0 + $0x8] sm:$0xff]  ;;  %v55_v26 = vld [vmem:[%s587_s0 + $0x10] sm:$0xff] }
  0x10   :  { %309 = vmatpush.msra.mxu2 %v77_v7  ;;  %310 = vmatpush.msra.mxu3 %v77_v7  ;;  %v57_v19 = vld [vmem:[%s587_s0 + $0x20] sm:$0xff]  ;;  %v58_v23 = vld [vmem:[%s587_s0 + $0x28] sm:$0xff]  ;;  %v59_v27 = vld [vmem:[%s587_s0 + $0x30] sm:$0xff] }
  0x11   :  { %92 = vmatpush.msra.mxu0 %v77_v7  ;;  %308 = vmatpush.msra.mxu1 %v77_v7  ;;  %v64_v28 = vld [vmem:[%s587_s0 + $0x58] sm:$0xff]  ;;  %v217_v32 = vld [vmem:[%s589_s2] sm:$0xff]  ;;  %v218_v44 = vld [vmem:[%s589_s2 + $0x8] sm:$0xff] }
  0x12   :  { %312 = vmatpush.msra.mxu2 %v76_v8  ;;  %313 = vmatpush.msra.mxu3 %v76_v8  ;;  %v68_v29 = vld [vmem:[%s587_s0 + $0x78] sm:$0xff]  ;;  %v221_v33 = vld [vmem:[%s589_s2 + $0x20] sm:$0xff]  ;;  %v222_v45 = vld [vmem:[%s589_s2 + $0x28] sm:$0xff] }
  0x13   :  { %93 = vmatpush.msra.mxu0 %v76_v8  ;;  %311 = vmatpush.msra.mxu1 %v76_v8  ;;  %v56_v30 = vld [vmem:[%s587_s0 + $0x18] sm:$0xff]  ;;  %v225_v38 = vld [vmem:[%s589_s2 + $0x40] sm:$0xff]  ;;  %v226_v50 = vld [vmem:[%s589_s2 + $0x48] sm:$0xff] }
  0x14   :  { %315 = vmatpush.msra.mxu2 %v75_v9  ;;  %316 = vmatpush.msra.mxu3 %v75_v9  ;;  %v60_v31 = vld [vmem:[%s587_s0 + $0x38] sm:$0xff]  ;;  %v229_v39 = vld [vmem:[%s589_s2 + $0x60] sm:$0xff]  ;;  %v230_v51 = vld [vmem:[%s589_s2 + $0x68] sm:$0xff] }
  0x15   :  { %94 = vmatpush.msra.mxu0 %v75_v9  ;;  %314 = vmatpush.msra.mxu1 %v75_v9  ;;  %v219_v56 = vld [vmem:[%s589_s2 + $0x10] sm:$0xff]  ;;  %v220_v4 = vld [vmem:[%s589_s2 + $0x18] sm:$0xff] }
  0x16   :  { %318 = vmatpush.msra.mxu2 %v74_v10  ;;  %319 = vmatpush.msra.mxu3 %v74_v10  ;;  %v223_v57 = vld [vmem:[%s589_s2 + $0x30] sm:$0xff]  ;;  %v224_v5 = vld [vmem:[%s589_s2 + $0x38] sm:$0xff] }
  0x17   :  { %95 = vmatpush.msra.mxu0 %v74_v10  ;;  %317 = vmatpush.msra.mxu1 %v74_v10  ;;  %v227_v62 = vld [vmem:[%s589_s2 + $0x50] sm:$0xff]  ;;  %v228_v10 = vld [vmem:[%s589_s2 + $0x58] sm:$0xff] }
  0x18   :  { %321 = vmatpush.msra.mxu2 %v73_v11  ;;  %322 = vmatpush.msra.mxu3 %v73_v11  ;;  %v231_v63 = vld [vmem:[%s589_s2 + $0x70] sm:$0xff] }
  0x19   :  { %96 = vmatpush.msra.mxu0 %v73_v11  ;;  %320 = vmatpush.msra.mxu1 %v73_v11  ;;  %v232_v11 = vld [vmem:[%s589_s2 + $0x78] sm:$0xff] }
  0x1a   :  { %324 = vmatpush.msra.mxu2 %v72_v12  ;;  %325 = vmatpush.msra.mxu3 %v72_v12 }
  0x1b   :  { %97 = vmatpush.msra.mxu0 %v72_v12  ;;  %323 = vmatpush.msra.mxu1 %v72_v12 }
  0x1c   :  { %327 = vmatpush.msra.mxu2 %v71_v13  ;;  %328 = vmatpush.msra.mxu3 %v71_v13 }
  0x1d   :  { %98 = vmatpush.msra.mxu0 %v71_v13  ;;  %326 = vmatpush.msra.mxu1 %v71_v13 }
  0x1e   :  { %330 = vmatpush.msra.mxu2 %v70_v14  ;;  %331 = vmatpush.msra.mxu3 %v70_v14 }
  0x1f   :  { %99 = vmatpush.msra.mxu0 %v70_v14  ;;  %329 = vmatpush.msra.mxu1 %v70_v14 }
  0x20   :  { %333 = vmatpush.msra.mxu2 %v69_v15  ;;  %334 = vmatpush.msra.mxu3 %v69_v15 }
  0x21   :  { %125 = vmatmul.f32.vlgmr.msra.gmra.mxu2 %v61_v16  ;;  %137 = vmatmul.f32.vlgmr.msra.gmra.mxu3 %v65_v17 }
  0x22   :  { %100 = vmatpush.msra.mxu0 %v69_v15  ;;  %332 = vmatpush.msra.mxu1 %v69_v15 }
  0x23   :  { %101 = vmatmul.f32.vlgmr.msra.gmra.mxu0 %v53_v18  ;;  %113 = vmatmul.f32.vlgmr.msra.gmra.mxu1 %v57_v19 }
  0x29   :  { %128 = vmatmul.f32.gmra.mxu2 %v62_v20  ;;  %140 = vmatmul.f32.gmra.mxu3 %v66_v21 }
  0x2b   :  { %104 = vmatmul.f32.gmra.mxu0 %v54_v22  ;;  %116 = vmatmul.f32.gmra.mxu1 %v58_v23 }
  0x31   :  { %131 = vmatmul.f32.gmra.mxu2 %v63_v24  ;;  %143 = vmatmul.f32.gmra.mxu3 %v67_v25 }
  0x33   :  { %107 = vmatmul.f32.gmra.mxu0 %v55_v26  ;;  %119 = vmatmul.f32.gmra.mxu1 %v59_v27 }
  0x39   :  { %134 = vmatmul.f32.gmra.mxu2 %v64_v28  ;;  %146 = vmatmul.f32.gmra.mxu3 %v68_v29 }
  0x3b   :  { %110 = vmatmul.f32.gmra.mxu0 %v56_v30  ;;  %122 = vmatmul.f32.gmra.mxu1 %v60_v31 }
  0xa0   :  { %v102_v34 = vpop.f32.mrf.mxu0  ;;  %v114_v35 = vpop.f32.mrf.mxu1 }
  0xa1   :  { %201 = vst [vmem:[#allocation3] sm:$0xff] %v102_v34  ;;  %v233_v36 = vadd.f32 %v217_v32, %v102_v34  ;;  %v237_v37 = vadd.f32 %v221_v33, %v114_v35 }
  0xa2   :  { %205 = vst [vmem:[#allocation3 + $0x20] sm:$0xff] %v114_v35 }
  0xa3   :  { %249 = vst [vmem:[%s591_s4] sm:$0xff] %v233_v36 }
  0xa4   :  { %253 = vst [vmem:[%s591_s4 + $0x20] sm:$0xff] %v237_v37  ;;  %v126_v40 = vpop.f32.mrf.mxu2  ;;  %v138_v41 = vpop.f32.mrf.mxu3 }
  0xa5   :  { %209 = vst [vmem:[#allocation3 + $0x40] sm:$0xff] %v126_v40  ;;  %v241_v42 = vadd.f32 %v225_v38, %v126_v40  ;;  %v245_v43 = vadd.f32 %v229_v39, %v138_v41 }
  0xa6   :  { %213 = vst [vmem:[#allocation3 + $0x60] sm:$0xff] %v138_v41 }
  0xa7   :  { %257 = vst [vmem:[%s591_s4 + $0x40] sm:$0xff] %v241_v42 }
  0xa8   :  { %261 = vst [vmem:[%s591_s4 + $0x60] sm:$0xff] %v245_v43  ;;  %v105_v46 = vpop.f32.mrf.mxu0  ;;  %v117_v47 = vpop.f32.mrf.mxu1 }
  0xa9   :  { %202 = vst [vmem:[#allocation3 + $0x8] sm:$0xff] %v105_v46  ;;  %v234_v48 = vadd.f32 %v218_v44, %v105_v46  ;;  %v238_v49 = vadd.f32 %v222_v45, %v117_v47 }
  0xaa   :  { %206 = vst [vmem:[#allocation3 + $0x28] sm:$0xff] %v117_v47 }
  0xab   :  { %250 = vst [vmem:[%s591_s4 + $0x8] sm:$0xff] %v234_v48 }
  0xac   :  { %254 = vst [vmem:[%s591_s4 + $0x28] sm:$0xff] %v238_v49  ;;  %v129_v52 = vpop.f32.mrf.mxu2  ;;  %v141_v53 = vpop.f32.mrf.mxu3 }
  0xad   :  { %210 = vst [vmem:[#allocation3 + $0x48] sm:$0xff] %v129_v52  ;;  %v242_v54 = vadd.f32 %v226_v50, %v129_v52  ;;  %v246_v55 = vadd.f32 %v230_v51, %v141_v53 }
  0xae   :  { %214 = vst [vmem:[#allocation3 + $0x68] sm:$0xff] %v141_v53 }
  0xaf   :  { %258 = vst [vmem:[%s591_s4 + $0x48] sm:$0xff] %v242_v54 }
  0xb0   :  { %262 = vst [vmem:[%s591_s4 + $0x68] sm:$0xff] %v246_v55  ;;  %v108_v58 = vpop.f32.mrf.mxu0  ;;  %v120_v59 = vpop.f32.mrf.mxu1 }
  0xb1   :  { %203 = vst [vmem:[#allocation3 + $0x10] sm:$0xff] %v108_v58  ;;  %v235_v60 = vadd.f32 %v219_v56, %v108_v58  ;;  %v239_v61 = vadd.f32 %v223_v57, %v120_v59 }
  0xb2   :  { %207 = vst [vmem:[#allocation3 + $0x30] sm:$0xff] %v120_v59 }
  0xb3   :  { %251 = vst [vmem:[%s591_s4 + $0x10] sm:$0xff] %v235_v60 }
  0xb4   :  { %255 = vst [vmem:[%s591_s4 + $0x30] sm:$0xff] %v239_v61  ;;  %v132_v0 = vpop.f32.mrf.mxu2  ;;  %v144_v1 = vpop.f32.mrf.mxu3 }
  0xb5   :  { %211 = vst [vmem:[#allocation3 + $0x50] sm:$0xff] %v132_v0  ;;  %v243_v2 = vadd.f32 %v227_v62, %v132_v0  ;;  %v247_v3 = vadd.f32 %v231_v63, %v144_v1 }
  0xb6   :  { %215 = vst [vmem:[#allocation3 + $0x70] sm:$0xff] %v144_v1 }
  0xb7   :  { %259 = vst [vmem:[%s591_s4 + $0x50] sm:$0xff] %v243_v2 }
  0xb8   :  { %263 = vst [vmem:[%s591_s4 + $0x70] sm:$0xff] %v247_v3  ;;  %v111_v6 = vpop.f32.mrf.mxu0  ;;  %v123_v7 = vpop.f32.mrf.mxu1 }
  0xb9   :  { %204 = vst [vmem:[#allocation3 + $0x18] sm:$0xff] %v111_v6  ;;  %v236_v8 = vadd.f32 %v220_v4, %v111_v6  ;;  %v240_v9 = vadd.f32 %v224_v5, %v123_v7 }
  0xba   :  { %208 = vst [vmem:[#allocation3 + $0x38] sm:$0xff] %v123_v7 }
  0xbb   :  { %252 = vst [vmem:[%s591_s4 + $0x18] sm:$0xff] %v236_v8 }
  0xbc   :  { %256 = vst [vmem:[%s591_s4 + $0x38] sm:$0xff] %v240_v9  ;;  %v135_v12 = vpop.f32.mrf.mxu2  ;;  %v147_v13 = vpop.f32.mrf.mxu3 }
  0xbd   :  { %212 = vst [vmem:[#allocation3 + $0x58] sm:$0xff] %v135_v12  ;;  %v244_v14 = vadd.f32 %v228_v10, %v135_v12  ;;  %v248_v15 = vadd.f32 %v232_v11, %v147_v13 }
  0xbe   :  { %216 = vst [vmem:[#allocation3 + $0x78] sm:$0xff] %v147_v13 }
  0xbf   :  { %260 = vst [vmem:[%s591_s4 + $0x58] sm:$0xff] %v244_v14 }
  0xc0   :  { %264 = vst [vmem:[%s591_s4 + $0x78] sm:$0xff] %v248_v15 }
  0xc1   :  { %277 = dma.vmem_to_hbm [thread:$0]  %s270_s1, 2048, %s272_s29, [#allocation4], %s365_s9, %s365_s9, %s366_s10  }
  0xc2   :  { %362 = dma.done.wait [#allocation4], 2048  }
  0xc3   :  { %363 = vsyncadd [#allocation4], 4294965248 }
  0xc4   :  { %286 = vsyncpa [#allocation4], 1 }

// kernel: _lgndice_forward.5
= control target key start
LH: loop header
LB: loop body
LE: loop exit
PB: predicated region body
PF: predicated region fallthrough
CT: control target
= control target key end

     0   :  { %v55_v3 = vlaneseq  ;;  %s1185_s0 = inlined_call_operand.vmem [shape: f32[32,128], index: 0, kind: input, shape index: {}]   ;;  %s1186_s1 = inlined_call_operand.vmem [shape: f32[32,128], index: 1, kind: input, shape index: {}]   ;;  %s1187_s2 = inlined_call_operand.vmem [shape: f32[32,128], index: 2, kind: input, shape index: {}]   ;;  %s1188_s3 = inlined_call_operand.vmem [shape: f32[32,1], index: 3, kind: input, shape index: {}]   ;;  %s1189_s4 = inlined_call_operand.vmem [shape: f32[32,1], index: 4, kind: input, shape index: {}]   ;;  %s1190_s5 = inlined_call_operand.vmem [shape: f32[32,1], index: 5, kind: input, shape index: {}]   ;;  %s1191_s6 = inlined_call_operand.vmem [shape: f32[32,1], index: 6, kind: input, shape index: {}]   ;;  %s1192_s7 = inlined_call_operand.hbm [shape: f32[1], index: 7, kind: output, shape index: {}]  }
   0x1   :  { %v838_v0 = vld [vmem:[%s1185_s0] sm:$0xff]  ;;  %v857_v7 = vld [vmem:[%s1185_s0 + $0x8] sm:$0xff] }
   0x2   :  { %v843_v1 = vld [vmem:[%s1187_s2] sm:$0xff]  ;;  %v56_v6 = vand.u32 127, %v55_v3  ;;  %v862_v8 = vld [vmem:[%s1187_s2 + $0x8] sm:$0xff] }
   0x3   :  { %v848_v2 = vld [vmem:[%s1186_s1] sm:$0xff]  ;;  %v64_v4 = vmul.f32 %v843_v1, %v838_v0  ;;  %v867_v9 = vld [vmem:[%s1186_s1 + $0x8] sm:$0xff] }
   0x4   :  { %v60_v5 = vmul.f32 %v848_v2, %v838_v0  ;;  %vm57_vm0 = vcmp.lt.s32.totalorder %v56_v6, 32 }
   0x5   :  { %76 = vadd.xlane.f32.xlu1 %v64_v4 }
   0x6   :  { %68 = vadd.xlane.f32.xlu0 %v60_v5 }
   0x7   :  { %12 = vsyncpa [#allocation3], 0  ;;  %v791_v10 = vmov 0.0   ;;  %v65_v13 = vmul.f32 %v862_v8, %v857_v7  ;;  %v61_v14 = vmul.f32 %v867_v9, %v857_v7  ;;  %v876_v18 = vld [vmem:[%s1185_s0 + $0x10] sm:$0xff]  ;;  %v895_v25 = vld [vmem:[%s1185_s0 + $0x18] sm:$0xff]  ;;  %s792_s0 = smov 96  }
   0x8   :  { %v676_v11 = vsel %vm57_vm0, 1.0, %v791_v10  ;;  %v881_v19 = vld [vmem:[%s1186_s1 + $0x10] sm:$0xff]  ;;  %v900_v26 = vld [vmem:[%s1187_s2 + $0x18] sm:$0xff]  ;;  %vm160_vm1 = vcmask 7168   ;;  %vm470_vm2 = vcmask 261120  }
   0x9   :  { %v84_v12 = vmul.f32 %v676_v11, %v60_v5  ;;  %v85_v15 = vmul.f32 %v676_v11, %v61_v14  ;;  %v97_v16 = vmul.f32 %v676_v11, %v65_v13  ;;  %v96_v17 = vmul.f32 %v676_v11, %v64_v4  ;;  %v888_v21 = vld [vmem:[%s1187_s2 + $0x10] sm:$0xff]  ;;  %v905_v27 = vld [vmem:[%s1186_s1 + $0x18] sm:$0xff] }
   0xa   :  { %v62_v20 = vmul.f32 %v881_v19, %v876_v18  ;;  %v66_v23 = vmul.f32 %v888_v21, %v876_v18  ;;  %v67_v28 = vmul.f32 %v900_v26, %v895_v25  ;;  %v63_v29 = vmul.f32 %v905_v27, %v895_v25 }
   0xb   :  { %88 = vadd.xlane.f32.xlu2 %v84_v12 }
   0xc   :  { %v86_v22 = vmul.f32 %v676_v11, %v62_v20  ;;  %v98_v24 = vmul.f32 %v676_v11, %v66_v23  ;;  %v87_v30 = vmul.f32 %v676_v11, %v63_v29  ;;  %v99_v31 = vmul.f32 %v676_v11, %v67_v28 }
   0xd   :  { %78 = vadd.xlane.f32.xlu1 %v65_v13 }
   0xe   :  { %70 = vadd.xlane.f32.xlu0 %v61_v14 }
  0x13   :  { %90 = vadd.xlane.f32.xlu2 %v85_v15 }
  0x15   :  { %102 = vadd.xlane.f32.xlu1 %v97_v16 }
  0x16   :  { %100 = vadd.xlane.f32.xlu0 %v96_v17 }
  0x1b   :  { %72 = vadd.xlane.f32.xlu2 %v62_v20 }
  0x1d   :  { %92 = vadd.xlane.f32.xlu1 %v86_v22 }
  0x1e   :  { %80 = vadd.xlane.f32.xlu0 %v66_v23 }
  0x23   :  { %104 = vadd.xlane.f32.xlu2 %v98_v24  ;;  %v950_v24 = vld [vmem:[%s1191_s6] sm:$0xff] }
  0x25   :  { %82 = vadd.xlane.f32.xlu1 %v67_v28  ;;  %v955_v28 = vld [vmem:[%s1191_s6 + $0x8] sm:$0xff] }
  0x26   :  { %74 = vadd.xlane.f32.xlu0 %v63_v29 }
  0x2b   :  { %94 = vadd.xlane.f32.xlu2 %v87_v30 }
  0x2e   :  { %106 = vadd.xlane.f32.xlu0 %v99_v31 }
  0x3e   :  { %450 = vrot.lane.b32.xlu1 %v848_v2, %s792_s0 }
  0x42   :  { %507 = vrot.lane.b32.xlu0 %v843_v1, %s792_s0 }
  0x43   :  { %452 = vrot.lane.b32.xlu2 %v867_v9, %s792_s0 }
  0x46   :  { %454 = vrot.lane.b32.xlu1 %v881_v19, %s792_s0 }
  0x4a   :  { %511 = vrot.lane.b32.xlu0 %v888_v21, %s792_s0 }
  0x4b   :  { %509 = vrot.lane.b32.xlu2 %v862_v8, %s792_s0 }
  0x4e   :  { %584 = vrot.lane.b32.xlu1 %v857_v7, %s792_s0 }
  0x52   :  { %456 = vrot.lane.b32.xlu0 %v905_v27, %s792_s0 }
  0x53   :  { %582 = vrot.lane.b32.xlu2 %v838_v0, %s792_s0 }
  0x56   :  { %586 = vrot.lane.b32.xlu1 %v876_v18, %s792_s0 }
  0x5a   :  { %588 = vrot.lane.b32.xlu0 %v895_v25, %s792_s0 }
  0x5b   :  { %513 = vrot.lane.b32.xlu2 %v900_v26, %s792_s0 }
  0x78   :  { %v77_v32 = vpop.xlane.xlu1 %76 }
  0x79   :  { %v69_v33 = vpop.xlane.xlu0 %68 }
  0x7a   :  { %v923_v34 = vsub.f32 %v69_v33, %v77_v32 }
  0x7c   :  { %v339_v35 = vand.u32 2147483647, %v923_v34 }
  0x7e   :  { %v343_v36 = vsub.f32 0.0, %v339_v35  ;;  %v89_v37 = vpop.xlane.xlu2 %88  ;;  %v430_v35 = vsel %vm160_vm1, %v950_v24, 0.0 }
  0x7f   :  { %v108_v52 = vsub.f32 %v69_v33, %v89_v37 }
  0x80   :  { %v79_v38 = vpop.xlane.xlu1 %78  ;;  %v347_v40 = vmul.f32 1.442695, %v343_v36  ;;  %v431_v36 = vsel %vm160_vm1, %v955_v28, 0.0 }
  0x81   :  { %v71_v39 = vpop.xlane.xlu0 %70 }
  0x82   :  { %v926_v41 = vsub.f32 %v71_v39, %v79_v38  ;;  %707 = vpow2.f32 %v347_v40 }
  0x84   :  { %v340_v42 = vand.u32 2147483647, %v926_v41 }
  0x86   :  { %v344_v43 = vsub.f32 0.0, %v340_v42  ;;  %v91_v44 = vpop.xlane.xlu2 %90  ;;  %v969_v42 = vld [vmem:[%s1191_s6 + $0x10] sm:$0xff] }
  0x87   :  { %v109_v46 = vsub.f32 %v71_v39, %v91_v44  ;;  %1195 = vst [vmem:[#allocation5_spill] sm:$0xff] %v969_v42 }
  0x88   :  { %v349_v45 = vmul.f32 1.442695, %v344_v43  ;;  %v103_v47 = vpop.xlane.xlu1 %102  ;;  %v708_v54 = vpop.eup %707 }
  0x89   :  { %v101_v48 = vpop.xlane.xlu0 %100  ;;  %v113_v49 = vsub.f32 %v79_v38, %v103_v47  ;;  %v929_v50 = vsub.f32 %v91_v44, %v103_v47  ;;  %v355_v3 = vadd.f32 1.0, %v708_v54  ;;  %v335_v44 = vmin.f32 %v923_v34, 0.0 }
  0x8a   :  { %709 = vpow2.f32 %v349_v45  ;;  %v112_v51 = vsub.f32 %v77_v32, %v101_v48  ;;  %v931_v53 = vsub.f32 %v89_v37, %v101_v48  ;;  %v432_v54 = vadd.f32 %v431_v36, %v430_v35 }
  0x8b   :  { %v125_v55 = vand.u32 2147483647, %v929_v50  ;;  %v934_v56 = vsub.f32 %v113_v49, %v109_v46  ;;  %v936_v57 = vsub.f32 %v109_v46, %v113_v49 }
  0x8c   :  { %v124_v58 = vand.u32 2147483647, %v931_v53  ;;  %v939_v59 = vsub.f32 %v112_v51, %v108_v52  ;;  %v941_v60 = vsub.f32 %v108_v52, %v112_v51 }
  0x8d   :  { %v129_v61 = vsub.f32 0.0, %v125_v55  ;;  %v196_v62 = vand.u32 2147483647, %v934_v56  ;;  %v270_v4 = vand.u32 2147483647, %v936_v57 }
  0x8e   :  { %v73_v63 = vpop.xlane.xlu2 %72  ;;  %v195_v5 = vand.u32 2147483647, %v939_v59  ;;  %v128_v12 = vsub.f32 0.0, %v124_v58  ;;  %v269_v14 = vand.u32 2147483647, %v941_v60 }
  0x8f   :  { %v134_v10 = vmul.f32 1.442695, %v129_v61  ;;  %v200_v11 = vsub.f32 0.0, %v196_v62  ;;  %v274_v13 = vsub.f32 0.0, %v270_v4 }
  0x90   :  { %v710_v6 = vpop.eup %709  ;;  %v93_v15 = vpop.xlane.xlu1 %92  ;;  %v199_v23 = vsub.f32 0.0, %v195_v5  ;;  %v132_v29 = vmul.f32 1.442695, %v128_v12  ;;  %v273_v31 = vsub.f32 0.0, %v269_v14  ;;  %v336_v5 = vmin.f32 %v926_v41, 0.0 }
  0x91   :  { %v81_v16 = vpop.xlane.xlu0 %80  ;;  %v356_v17 = vadd.f32 1.0, %v710_v6  ;;  %711 = vpow2.f32 %v134_v10  ;;  %v205_v20 = vmul.f32 1.442695, %v200_v11  ;;  %v279_v22 = vmul.f32 1.442695, %v274_v13 }
  0x92   :  { %713 = vlog2.f32 %v355_v3  ;;  %v957_v30 = vsub.f32 %v73_v63, %v81_v16  ;;  %v203_v37 = vmul.f32 1.442695, %v199_v23  ;;  %v110_v38 = vsub.f32 %v73_v63, %v93_v15  ;;  %v980_v63 = vld [vmem:[%s1191_s6 + $0x18] sm:$0xff] }
  0x93   :  { %715 = vpow2.f32 %v205_v20  ;;  %v277_v47 = vmul.f32 1.442695, %v273_v31  ;;  %v433_v3 = vsel %vm160_vm1, %v969_v42, 0.0  ;;  %v121_v12 = vmin.f32 %v929_v50, 0.0 }
  0x94   :  { %717 = vpow2.f32 %v279_v22  ;;  %v341_v32 = vand.u32 2147483647, %v957_v30  ;;  %v1198_v42 = vmin.f32 %v931_v53, 0.0 }
  0x95   :  { %719 = vlog2.f32 %v356_v17  ;;  %v435_v17 = vsel %vm160_vm1, %v980_v63, 0.0 }
  0x96   :  { %v105_v33 = vpop.xlane.xlu2 %104  ;;  %721 = vpow2.f32 %v132_v29  ;;  %v345_v45 = vsub.f32 0.0, %v341_v32 }
  0x97   :  { %v114_v39 = vsub.f32 %v81_v16, %v105_v33  ;;  %v964_v40 = vsub.f32 %v93_v15, %v105_v33  ;;  %v712_v43 = vpop.eup %711  ;;  %723 = vpow2.f32 %v203_v37  ;;  %v434_v16 = vadd.f32 %v433_v3, %v432_v54 }
  0x98   :  { %v714_v46 = vpop.eup %713  ;;  %v83_v51 = vpop.xlane.xlu1 %82  ;;  %v141_v58 = vadd.f32 1.0, %v712_v43  ;;  %v351_v61 = vmul.f32 1.442695, %v345_v45 }
  0x99   :  { %v126_v48 = vand.u32 2147483647, %v964_v40  ;;  %v973_v49 = vsub.f32 %v114_v39, %v110_v38  ;;  %v75_v52 = vpop.xlane.xlu0 %74  ;;  %v716_v55 = vpop.eup %715  ;;  %v975_v62 = vsub.f32 %v110_v38, %v114_v39  ;;  %v360_v37 = vmul.f32 0.6931472, %v714_v46  ;;  %v1001_v46 = vld [vmem:[%s1189_s4] sm:$0xff] }
  0x9a   :  { %v718_v4 = vpop.eup %717  ;;  %v985_v10 = vsub.f32 %v75_v52, %v83_v51  ;;  %v212_v13 = vadd.f32 1.0, %v716_v55  ;;  %725 = vpow2.f32 %v351_v61  ;;  %v436_v54 = vadd.f32 %v435_v17, %v434_v16 }
  0x9b   :  { %v130_v6 = vsub.f32 0.0, %v126_v48  ;;  %v720_v11 = vpop.eup %719  ;;  %v197_v14 = vand.u32 2147483647, %v973_v49  ;;  %v286_v15 = vadd.f32 1.0, %v718_v4  ;;  %727 = vpow2.f32 %v277_v47 }
  0x9c   :  { %v722_v20 = vpop.eup %721  ;;  %729 = vlog2.f32 %v141_v58  ;;  %v271_v29 = vand.u32 2147483647, %v975_v62  ;;  %v342_v35 = vand.u32 2147483647, %v985_v10  ;;  %437 = vadd.xlane.f32.xlu2 %v436_v54  ;;  %v362_v17 = vmul.f32 0.6931472, %v720_v11 }
  0x9d   :  { %v136_v22 = vmul.f32 1.442695, %v130_v6  ;;  %v201_v23 = vsub.f32 0.0, %v197_v14  ;;  %731 = vlog2.f32 %v212_v13  ;;  %v724_v43 = vpop.eup %723  ;;  %v140_v45 = vadd.f32 1.0, %v722_v20  ;;  %v1006_v13 = vld [vmem:[%s1189_s4 + $0x8] sm:$0xff] }
  0x9e   :  { %v95_v36 = vpop.xlane.xlu2 %94  ;;  %v275_v39 = vsub.f32 0.0, %v271_v29  ;;  %733 = vlog2.f32 %v286_v15  ;;  %v346_v47 = vsub.f32 0.0, %v342_v35  ;;  %v397_v35 = vsel %vm160_vm1, %v1001_v46, 0.0 }
  0x9f   :  { %v207_v38 = vmul.f32 1.442695, %v201_v23  ;;  %735 = vpow2.f32 %v136_v22  ;;  %v111_v61 = vsub.f32 %v75_v52, %v95_v36  ;;  %v211_v52 = vadd.f32 1.0, %v724_v43 }
  0xa0   :  { %v726_v55 = vpop.eup %725  ;;  %v281_v58 = vmul.f32 1.442695, %v275_v39  ;;  %v353_v14 = vmul.f32 1.442695, %v346_v47  ;;  %v1019_v39 = vsub.f32 %v335_v44, %v360_v37  ;;  %v1031_v44 = vld [vmem:[%s1189_s4 + $0x10] sm:$0xff]  ;;  %v267_v33 = vmin.f32 %v975_v62, 0.0 }
  0xa1   :  { %v107_v48 = vpop.xlane.xlu0 %106  ;;  %v728_v4 = vpop.eup %727  ;;  %v357_v6 = vadd.f32 1.0, %v726_v55  ;;  %737 = vpow2.f32 %v207_v38  ;;  %v400_v50 = vsel %vm160_vm1, %v1031_v44, 0.0  ;;  %v338_v31 = vmin.f32 %v985_v10, 0.0 }
  0xa2   :  { %v115_v3 = vsub.f32 %v83_v51, %v107_v48  ;;  %v996_v32 = vsub.f32 %v95_v36, %v107_v48  ;;  %v730_v15 = vpop.eup %729  ;;  %739 = vpow2.f32 %v281_v58  ;;  %v285_v29 = vadd.f32 1.0, %v728_v4 }
  0xa3   :  { %741 = vlog2.f32 %v357_v6  ;;  %v732_v23 = vpop.eup %731  ;;  %v398_v36 = vsel %vm160_vm1, %v1006_v13, 0.0  ;;  %v147_v11 = vmul.f32 0.6931472, %v730_v15  ;;  %v337_v48 = vmin.f32 %v957_v30, 0.0 }
  0xa4   :  { %v1009_v16 = vsub.f32 %v115_v3, %v111_v61  ;;  %v127_v22 = vand.u32 2147483647, %v996_v32  ;;  %743 = vpow2.f32 %v353_v14  ;;  %v734_v38 = vpop.eup %733  ;;  %v1023_v55 = vsub.f32 %v111_v61, %v115_v3 }
  0xa5   :  { %745 = vlog2.f32 %v140_v45  ;;  %v736_v47 = vpop.eup %735  ;;  %v368_v4 = vsub.f32 %v336_v5, %v362_v17  ;;  %v399_v37 = vadd.f32 %v398_v36, %v397_v35  ;;  %v153_v3 = vsub.f32 %v121_v12, %v147_v11  ;;  %v1044_v17 = vld [vmem:[%s1190_s5] sm:$0xff]  ;;  %v1051_v12 = vld [vmem:[%s1190_s5 + $0x8] sm:$0xff] }
  0xa6   :  { %v131_v43 = vsub.f32 0.0, %v127_v22  ;;  %747 = vlog2.f32 %v211_v52  ;;  %v198_v54 = vand.u32 2147483647, %v1009_v16  ;;  %v142_v34 = vadd.f32 1.0, %v736_v47  ;;  %v1039_v52 = vld [vmem:[%s1189_s4 + $0x18] sm:$0xff] }
  0xa7   :  { %v738_v58 = vpop.eup %737  ;;  %749 = vlog2.f32 %v285_v29  ;;  %v272_v5 = vand.u32 2147483647, %v1023_v55  ;;  %v218_v29 = vmul.f32 0.6931472, %v732_v23  ;;  %v401_v47 = vadd.f32 %v400_v50, %v399_v37 }
  0xa8   :  { %v740_v45 = vpop.eup %739  ;;  %v213_v30 = vadd.f32 1.0, %v738_v58  ;;  %v138_v14 = vmul.f32 1.442695, %v131_v43  ;;  %v202_v15 = vsub.f32 0.0, %v198_v54  ;;  %751 = vlog2.f32 %v142_v34  ;;  %v1056_v54 = vld [vmem:[%s1190_s5 + $0x10] sm:$0xff] }
  0xa9   :  { %v742_v61 = vpop.eup %741  ;;  %v287_v41 = vadd.f32 1.0, %v740_v45  ;;  %v276_v43 = vsub.f32 0.0, %v272_v5  ;;  %v402_v34 = vsel %vm160_vm1, %v1039_v52, 0.0  ;;  %v1063_v45 = vld [vmem:[%s1190_s5 + $0x18] sm:$0xff]  ;;  %v416_v50 = vsel %vm160_vm1, %v1056_v54, 0.0 }
  0xaa   :  { %v744_v22 = vpop.eup %743  ;;  %753 = vlog2.f32 %v213_v30  ;;  %v209_v35 = vmul.f32 1.442695, %v202_v15  ;;  %v364_v58 = vmul.f32 0.6931472, %v742_v61  ;;  %1196 = vst [vmem:[#allocation6_spill] sm:$0xff] %v1063_v45  ;;  %v413_v30 = vsel %vm160_vm1, %v1044_v17, 0.0 }
  0xab   :  { %v746_v36 = vpop.eup %745  ;;  %755 = vlog2.f32 %v287_v41  ;;  %v358_v11 = vadd.f32 1.0, %v744_v22  ;;  %v283_v37 = vmul.f32 1.442695, %v276_v43  ;;  %v403_v15 = vadd.f32 %v402_v34, %v401_v47 }
  0xac   :  { %v748_v23 = vpop.eup %747  ;;  %757 = vpow2.f32 %v138_v14  ;;  %v414_v41 = vsel %vm160_vm1, %v1051_v12, 0.0  ;;  %v1072_v14 = vld [vmem:[%s1188_s3 + $0x8] sm:$0xff]  ;;  %v145_v61 = vmul.f32 0.6931472, %v746_v36  ;;  %v292_v6 = vmul.f32 0.6931472, %v734_v38 }
  0xad   :  { %759 = vlog2.f32 %v358_v11  ;;  %v750_v5 = vpop.eup %749  ;;  %v415_v22 = vadd.f32 %v414_v41, %v413_v30  ;;  %v216_v11 = vmul.f32 0.6931472, %v748_v23  ;;  %404 = vadd.xlane.f32.xlu1 %v403_v15  ;;  %v418_v43 = vsel %vm160_vm1, %v1063_v45, 0.0 }
  0xae   :  { %761 = vpow2.f32 %v209_v35  ;;  %v752_v20 = vpop.eup %751  ;;  %v369_v34 = vsub.f32 %v337_v48, %v364_v58  ;;  %v193_v51 = vmin.f32 %v973_v49, 0.0  ;;  %v157_v30 = vmul.f32 %v153_v3, %v1072_v14 }
  0xaf   :  { %763 = vpow2.f32 %v283_v37  ;;  %v417_v36 = vadd.f32 %v416_v50, %v415_v22  ;;  %v149_v41 = vmul.f32 0.6931472, %v752_v20  ;;  %v372_v38 = vsel %vm160_vm1, %v368_v4, 0.0  ;;  %v39_v20 = vld [vmem:[%s1188_s3] sm:$0xff] }
  0xb0   :  { %v754_v47 = vpop.eup %753  ;;  %v1197_v37 = vmin.f32 %v934_v56, 0.0  ;;  %v152_v48 = vsub.f32 %v1198_v42, %v145_v61  ;;  %v290_v58 = vmul.f32 0.6931472, %v750_v5  ;;  %v1199_v62 = vmin.f32 %v936_v57, 0.0 }
  0xb1   :  { %v756_v35 = vpop.eup %755  ;;  %v419_v49 = vadd.f32 %v418_v43, %v417_v36  ;;  %v1200_v10 = vmin.f32 %v939_v59, 0.0  ;;  %v371_v56 = vsel %vm160_vm1, %v1019_v39, 0.0  ;;  %v220_v53 = vmul.f32 0.6931472, %v754_v47 }
  0xb2   :  { %v758_v23 = vpop.eup %757  ;;  %v224_v15 = vsub.f32 %v1197_v37, %v218_v29  ;;  %v298_v22 = vsub.f32 %v1199_v62, %v292_v6  ;;  %v373_v5 = vadd.f32 %v372_v38, %v371_v56  ;;  %v374_v61 = vsel %vm160_vm1, %v369_v34, 0.0 }
  0xb3   :  { %v760_v45 = vpop.eup %759  ;;  %v223_v4 = vsub.f32 %v1200_v10, %v216_v11  ;;  %v143_v3 = vadd.f32 1.0, %v758_v23  ;;  %420 = vadd.xlane.f32.xlu0 %v419_v49  ;;  %v1201_v6 = vmin.f32 %v964_v40, 0.0  ;;  %v294_v43 = vmul.f32 0.6931472, %v756_v35 }
  0xb4   :  { %v762_v29 = vpop.eup %761  ;;  %v366_v42 = vmul.f32 0.6931472, %v760_v45  ;;  %v156_v59 = vmul.f32 %v152_v48, %v39_v20  ;;  %v1202_v11 = vmin.f32 %v941_v60, 0.0  ;;  %v41_v45 = vld [vmem:[%s1188_s3 + $0x10] sm:$0xff]  ;;  %v375_v47 = vadd.f32 %v374_v61, %v373_v5  ;;  %v508_v56 = vpop.permute.xlu0 %507  ;;  %v42_v61 = vld [vmem:[%s1188_s3 + $0x18] sm:$0xff] }
  0xb5   :  { %v764_v57 = vpop.eup %763  ;;  %v154_v50 = vsub.f32 %v1201_v6, %v149_v41  ;;  %765 = vlog2.f32 %v143_v3  ;;  %v214_v36 = vadd.f32 1.0, %v762_v29  ;;  %v257_v34 = vsub.f32 1.0, %v39_v20 }
  0xb6   :  { %v297_v23 = vsub.f32 %v1202_v11, %v290_v58  ;;  %v288_v37 = vadd.f32 1.0, %v764_v57  ;;  %v370_v39 = vsub.f32 %v338_v31, %v366_v42  ;;  %v258_v38 = vsub.f32 1.0, %v1072_v14 }
  0xb7   :  { %767 = vlog2.f32 %v214_v36  ;;  %v225_v40 = vsub.f32 %v193_v51, %v220_v53  ;;  %v299_v41 = vsub.f32 %v267_v33, %v294_v43  ;;  %v158_v49 = vmul.f32 %v154_v50, %v41_v45  ;;  %v453_v51 = vpop.permute.xlu2 %452 }
  0xb8   :  { %769 = vlog2.f32 %v288_v37  ;;  %v376_v35 = vsel %vm160_vm1, %v370_v39, 0.0  ;;  %v259_v60 = vsub.f32 1.0, %v41_v45  ;;  %v161_v58 = vsel %vm160_vm1, %v156_v59, 0.0 }
  0xb9   :  { %v377_v48 = vadd.f32 %v376_v35, %v375_v47  ;;  %v162_v31 = vsel %vm160_vm1, %v157_v30, 0.0  ;;  %v227_v62 = vmul.f32 %v223_v4, %v39_v20  ;;  %v228_v10 = vmul.f32 %v224_v15, %v1072_v14  ;;  %v451_v30 = vpop.permute.xlu1 %450 }
  0xba   :  { %v301_v29 = vmul.f32 %v297_v23, %v257_v34  ;;  %v302_v42 = vmul.f32 %v298_v22, %v258_v38  ;;  %v123_v53 = vmin.f32 %v996_v32, 0.0  ;;  %v194_v33 = vmin.f32 %v1009_v16, 0.0 }
  0xbb   :  { %v766_v3 = vpop.eup %765  ;;  %378 = vadd.xlane.f32.xlu2 %v377_v48  ;;  %v229_v57 = vmul.f32 %v225_v40, %v41_v45  ;;  %v268_v14 = vmin.f32 %v1023_v55, 0.0  ;;  %v163_v15 = vadd.f32 %v162_v31, %v161_v58  ;;  %v164_v4 = vsel %vm160_vm1, %v158_v49, 0.0 }
  0xbc   :  { %v151_v5 = vmul.f32 0.6931472, %v766_v3  ;;  %v303_v6 = vmul.f32 %v299_v41, %v259_v60  ;;  %v231_v32 = vsel %vm160_vm1, %v227_v62, 0.0  ;;  %v232_v16 = vsel %vm160_vm1, %v228_v10, 0.0 }
  0xbd   :  { %v768_v20 = vpop.eup %767  ;;  %v260_v36 = vsub.f32 1.0, %v42_v61  ;;  %v305_v11 = vsel %vm160_vm1, %v301_v29, 0.0  ;;  %v306_v23 = vsel %vm160_vm1, %v302_v42, 0.0  ;;  %v234_v55 = vsel %vm160_vm1, %v229_v57, 0.0 }
  0xbe   :  { %v770_v22 = vpop.eup %769  ;;  %v155_v50 = vsub.f32 %v123_v53, %v151_v5  ;;  %v222_v43 = vmul.f32 0.6931472, %v768_v20  ;;  %v165_v45 = vadd.f32 %v164_v4, %v163_v15  ;;  %v308_v34 = vsel %vm160_vm1, %v303_v6, 0.0  ;;  %v512_v53 = vpop.permute.xlu0 %511 }
  0xbf   :  { %v296_v59 = vmul.f32 0.6931472, %v770_v22  ;;  %v233_v38 = vadd.f32 %v232_v16, %v231_v32  ;;  %v519_v35 = vsub.f32 %v843_v1, %v508_v56  ;;  %v307_v41 = vadd.f32 %v306_v23, %v305_v11  ;;  %v510_v5 = vpop.permute.xlu2 %509 }
  0xc0   :  { %v159_v37 = vmul.f32 %v155_v50, %v42_v61  ;;  %v226_v39 = vsub.f32 %v194_v33, %v222_v43  ;;  %v462_v10 = vsub.f32 %v848_v2, %v451_v30  ;;  %v463_v42 = vsub.f32 %v867_v9, %v453_v51 }
  0xc1   :  { %v300_v47 = vsub.f32 %v268_v14, %v296_v59  ;;  %v235_v58 = vadd.f32 %v234_v55, %v233_v38  ;;  %v309_v31 = vadd.f32 %v308_v34, %v307_v41  ;;  %v523_v33 = vmul.f32 %v519_v35, %v519_v35  ;;  %v455_v56 = vpop.permute.xlu1 %454 }
  0xc2   :  { %v166_v40 = vsel %vm160_vm1, %v159_v37, 0.0  ;;  %v230_v48 = vmul.f32 %v226_v39, %v42_v61  ;;  %v466_v61 = vmul.f32 %v462_v10, %v462_v10  ;;  %v467_v57 = vmul.f32 %v463_v42, %v463_v42 }
  0xc3   :  { %v167_v49 = vadd.f32 %v166_v40, %v165_v45  ;;  %v304_v60 = vmul.f32 %v300_v47, %v260_v36  ;;  %v527_v20 = vsel %vm470_vm2, %v523_v33, 0.0  ;;  %v521_v2 = vsub.f32 %v888_v21, %v512_v53 }
  0xc4   :  { %v236_v62 = vsel %vm160_vm1, %v230_v48, 0.0  ;;  %v471_v30 = vsel %vm470_vm2, %v466_v61, 0.0  ;;  %v520_v14 = vsub.f32 %v862_v8, %v510_v5  ;;  %v474_v9 = vsel %vm470_vm2, %v467_v57, 0.0 }
  0xc5   :  { %168 = vadd.xlane.f32.xlu2 %v167_v49  ;;  %v310_v3 = vsel %vm160_vm1, %v304_v60, 0.0  ;;  %v237_v29 = vadd.f32 %v236_v62, %v235_v58  ;;  %v464_v51 = vsub.f32 %v881_v19, %v455_v56  ;;  %v525_v15 = vmul.f32 %v521_v2, %v521_v2 }
  0xc6   :  { %v311_v1 = vadd.f32 %v310_v3, %v309_v31  ;;  %v457_v4 = vpop.permute.xlu0 %456  ;;  %v524_v22 = vmul.f32 %v520_v14, %v520_v14  ;;  %v793_v49 = vmov 32.0  }
  0xc7   :  { %238 = vadd.xlane.f32.xlu1 %v237_v29  ;;  %v583_v6 = vpop.permute.xlu2 %582  ;;  %v468_v43 = vmul.f32 %v464_v51, %v464_v51  ;;  %v533_v32 = vsel %vm470_vm2, %v525_v15, 0.0  ;;  %v465_v21 = vsub.f32 %v905_v27, %v457_v4  ;;  %771 = vrcp.f32 %v793_v49 }
  0xc8   :  { %312 = vadd.xlane.f32.xlu0 %v311_v1  ;;  %v530_v16 = vsel %vm470_vm2, %v524_v22, 0.0  ;;  %v594_v8 = vsub.f32 %v838_v0, %v583_v6 }
  0xc9   :  { %v585_v50 = vpop.permute.xlu1 %584  ;;  %v477_v36 = vsel %vm470_vm2, %v468_v43, 0.0  ;;  %v469_v59 = vmul.f32 %v465_v21, %v465_v21 }
  0xca   :  { %v595_v19 = vsub.f32 %v857_v7, %v585_v50  ;;  %v598_v23 = vmul.f32 %v594_v8, %v594_v8 }
  0xcb   :  { %v480_v55 = vsel %vm470_vm2, %v469_v59, 0.0 }
  0xcc   :  { %v599_v37 = vmul.f32 %v595_v19, %v595_v19  ;;  %v602_v47 = vsel %vm470_vm2, %v598_v23, 0.0 }
  0xcd   :  { %528 = vadd.xlane.f32.xlu2 %v527_v20  ;;  %v772_v60 = vpop.eup %771 }
  0xce   :  { %v589_v11 = vpop.permute.xlu0 %588  ;;  %v605_v34 = vsel %vm470_vm2, %v599_v37, 0.0  ;;  %v178_v10 = vmul.f32 32.0, %v772_v60  ;;  %vm182_vm3 = vweird.f32 %v772_v60 }
  0xcf   :  { %472 = vadd.xlane.f32.xlu1 %v471_v30  ;;  %v514_v39 = vpop.permute.xlu2 %513  ;;  %v597_v27 = vsub.f32 %v895_v25, %v589_v11 }
  0xd0   :  { %475 = vadd.xlane.f32.xlu0 %v474_v9  ;;  %v522_v0 = vsub.f32 %v900_v26, %v514_v39  ;;  %v179_v5 = vsub.f32 1.0, %v178_v10 }
  0xd1   :  { %v587_v45 = vpop.permute.xlu1 %586  ;;  %v601_v38 = vmul.f32 %v597_v27, %v597_v27 }
  0xd2   :  { %v596_v7 = vsub.f32 %v876_v18, %v587_v45  ;;  %v526_v40 = vmul.f32 %v522_v0, %v522_v0  ;;  %v180_v51 = vmul.f32 %v772_v60, %v179_v5 }
  0xd3   :  { %v611_v41 = vsel %vm470_vm2, %v601_v38, 0.0 }
  0xd4   :  { %v600_v35 = vmul.f32 %v596_v7, %v596_v7  ;;  %v536_v48 = vsel %vm470_vm2, %v526_v40, 0.0  ;;  %v181_v8 = vadd.f32 %v772_v60, %v180_v51 }
  0xd5   :  { %534 = vadd.xlane.f32.xlu2 %v533_v32 }
  0xd6   :  { %v608_v25 = vsel %vm470_vm2, %v600_v35, 0.0 }
  0xd7   :  { %531 = vadd.xlane.f32.xlu1 %v530_v16 }
  0xd8   :  { %478 = vadd.xlane.f32.xlu0 %v477_v36 }
  0xdd   :  { %481 = vadd.xlane.f32.xlu2 %v480_v55 }
  0xdf   :  { %603 = vadd.xlane.f32.xlu1 %v602_v47 }
  0xe0   :  { %606 = vadd.xlane.f32.xlu0 %v605_v34  ;;  %v183_v34 = vsel %vm182_vm3, %v772_v60, %v181_v8 }
  0xe5   :  { %612 = vadd.xlane.f32.xlu2 %v611_v41 }
  0xe7   :  { %537 = vadd.xlane.f32.xlu1 %v536_v48 }
  0xe8   :  { %609 = vadd.xlane.f32.xlu0 %v608_v25 }
 0x10f   :  { %v438_v26 = vpop.xlane.xlu2 %437 }
 0x110   :  { %v439_v42 = vrot.slane %v438_v26, 4 }
 0x112   :  { %v440_v57 = vadd.f32 %v439_v42, %v438_v26 }
 0x114   :  { %v441_v43 = vrot.slane %v440_v57, 2 }
 0x116   :  { %v442_v27 = vadd.f32 %v441_v43, %v440_v57 }
 0x118   :  { %v443_v26 = vrot.slane %v442_v27, 1 }
 0x11a   :  { %v444_v10 = vadd.f32 %v443_v26, %v442_v27 }
 0x120   :  { %v405_v18 = vpop.xlane.xlu1 %404 }
 0x121   :  { %v406_v3 = vrot.slane %v405_v18, 4 }
 0x123   :  { %v407_v33 = vadd.f32 %v406_v3, %v405_v18 }
 0x125   :  { %v408_v15 = vrot.slane %v407_v33, 2 }
 0x126   :  { %v421_v31 = vpop.xlane.xlu0 %420 }
 0x127   :  { %v422_v29 = vrot.slane %v421_v31, 4  ;;  %v409_v11 = vadd.f32 %v408_v15, %v407_v33 }
 0x129   :  { %v423_v56 = vadd.f32 %v422_v29, %v421_v31  ;;  %v410_v35 = vrot.slane %v409_v11, 1 }
 0x12b   :  { %v424_v6 = vrot.slane %v423_v56, 2 }
 0x12d   :  { %v425_v39 = vadd.f32 %v424_v6, %v423_v56 }
 0x12e   :  { %v379_v58 = vpop.xlane.xlu2 %378 }
 0x12f   :  { %v380_v62 = vrot.slane %v379_v58, 4  ;;  %v426_v48 = vrot.slane %v425_v39, 1 }
 0x131   :  { %v381_v53 = vadd.f32 %v380_v62, %v379_v58  ;;  %v411_v58 = vadd.f32 %v410_v35, %v409_v11  ;;  %v427_v60 = vadd.f32 %v426_v48, %v425_v39 }
 0x133   :  { %v382_v2 = vrot.slane %v381_v53, 2 }
 0x135   :  { %v383_v36 = vadd.f32 %v382_v2, %v381_v53 }
 0x137   :  { %v384_v38 = vrot.slane %v383_v36, 1 }
 0x138   :  { %v169_v1 = vpop.xlane.xlu2 %168 }
 0x139   :  { %v170_v61 = vrot.slane %v169_v1, 4  ;;  %v385_v49 = vadd.f32 %v384_v38, %v383_v36 }
 0x13a   :  { %v239_v20 = vpop.xlane.xlu1 %238 }
 0x13b   :  { %v171_v30 = vadd.f32 %v170_v61, %v169_v1  ;;  %v313_v14 = vpop.xlane.xlu0 %312  ;;  %v240_v9 = vrot.slane %v239_v20, 4 }
 0x13c   :  { %v314_v4 = vrot.slane %v313_v14, 4 }
 0x13d   :  { %v172_v22 = vrot.slane %v171_v30, 2  ;;  %v241_v50 = vadd.f32 %v240_v9, %v239_v20 }
 0x13e   :  { %v315_v32 = vadd.f32 %v314_v4, %v313_v14 }
 0x13f   :  { %v242_v21 = vrot.slane %v241_v50, 2  ;;  %v173_v16 = vadd.f32 %v172_v22, %v171_v30 }
 0x140   :  { %v316_v19 = vrot.slane %v315_v32, 2  ;;  %v529_v59 = vpop.xlane.xlu2 %528 }
 0x141   :  { %v174_v23 = vrot.slane %v173_v16, 1  ;;  %v243_v37 = vadd.f32 %v242_v21, %v241_v50  ;;  %v539_v20 = vmul.f32 %v529_v59, %v1044_v17 }
 0x142   :  { %v473_v55 = vpop.xlane.xlu1 %472  ;;  %v317_v45 = vadd.f32 %v316_v19, %v315_v32  ;;  %v1203_v32 = vld [vmem:[#allocation6_spill] sm:$0xff] }
 0x143   :  { %v476_v47 = vpop.xlane.xlu0 %475  ;;  %v175_v0 = vadd.f32 %v174_v23, %v173_v16  ;;  %v244_v7 = vrot.slane %v243_v37, 1  ;;  %v483_v31 = vmul.f32 %v473_v55, %v1001_v46 }
 0x144   :  { %v318_v40 = vrot.slane %v317_v45, 1  ;;  %v484_v62 = vmul.f32 %v476_v47, %v1006_v13 }
 0x145   :  { %677 = vpush %v175_v0  ;;  %v245_v41 = vadd.f32 %v244_v7, %v243_v37  ;;  %v487_v53 = vsel %vm160_vm1, %v483_v31, 0.0 }
 0x146   :  { %679 = vpush %v183_v34  ;;  %v319_v25 = vadd.f32 %v318_v40, %v317_v45  ;;  %v488_v5 = vsel %vm160_vm1, %v484_v62, 0.0 }
 0x147   :  { %681 = vpush %v245_v41  ;;  %v489_v1 = vadd.f32 %v488_v5, %v487_v53 }
 0x148   :  { %683 = vpush %v319_v25  ;;  %v535_v18 = vpop.xlane.xlu2 %534 }
 0x149   :  { %685 = vpush %v385_v49  ;;  %v541_v14 = vmul.f32 %v535_v18, %v1056_v54 }
 0x14a   :  { %687 = vpush %v411_v58  ;;  %v532_v3 = vpop.xlane.xlu1 %531 }
 0x14b   :  { %689 = vpush %v427_v60  ;;  %v479_v29 = vpop.xlane.xlu0 %478  ;;  %v540_v13 = vmul.f32 %v532_v3, %v1051_v12  ;;  %v543_v12 = vsel %vm160_vm1, %v539_v20, 0.0  ;;  %v546_v6 = vsel %vm160_vm1, %v541_v14, 0.0 }
 0x14c   :  { %691 = vpush %v444_v10  ;;  %v485_v42 = vmul.f32 %v479_v29, %v1031_v44 }
 0x14d   :  { %v544_v9 = vsel %vm160_vm1, %v540_v13, 0.0 }
 0x14e   :  { %v490_v33 = vsel %vm160_vm1, %v485_v42, 0.0 }
 0x14f   :  { %v491_v57 = vadd.f32 %v490_v33, %v489_v1 }
 0x150   :  { %v482_v46 = vpop.xlane.xlu2 %481 }
 0x151   :  { %v486_v56 = vmul.f32 %v482_v46, %v1039_v52  ;;  %v545_v52 = vadd.f32 %v544_v9, %v543_v12 }
 0x152   :  { %v604_v61 = vpop.xlane.xlu1 %603 }
 0x153   :  { %v607_v2 = vpop.xlane.xlu0 %606  ;;  %v492_v30 = vsel %vm160_vm1, %v486_v56, 0.0  ;;  %v614_v15 = vmul.f32 %v604_v61, %v950_v24  ;;  %v547_v24 = vadd.f32 %v546_v6, %v545_v52 }
 0x154   :  { %v493_v44 = vadd.f32 %v492_v30, %v491_v57  ;;  %v615_v51 = vmul.f32 %v607_v2, %v955_v28  ;;  %v1204_v28 = vld [vmem:[#allocation5_spill] sm:$0xff] }
 0x155   :  { %v618_v22 = vsel %vm160_vm1, %v614_v15, 0.0 }
 0x156   :  { %494 = vadd.xlane.f32.xlu1 %v493_v44  ;;  %v619_v17 = vsel %vm160_vm1, %v615_v51, 0.0 }
 0x157   :  { %v620_v8 = vadd.f32 %v619_v17, %v618_v22 }
 0x158   :  { %v613_v4 = vpop.xlane.xlu2 %612 }
 0x159   :  { %v617_v54 = vmul.f32 %v613_v4, %v980_v63 }
 0x15a   :  { %v538_v50 = vpop.xlane.xlu1 %537 }
 0x15b   :  { %v610_v43 = vpop.xlane.xlu0 %609  ;;  %v542_v21 = vmul.f32 %v538_v50, %v1203_v32  ;;  %v623_v11 = vsel %vm160_vm1, %v617_v54, 0.0 }
 0x15c   :  { %v616_v16 = vmul.f32 %v610_v43, %v1204_v28 }
 0x15d   :  { %v548_v36 = vsel %vm160_vm1, %v542_v21, 0.0 }
 0x15e   :  { %v621_v19 = vsel %vm160_vm1, %v616_v16, 0.0  ;;  %v549_v59 = vadd.f32 %v548_v36, %v547_v24 }
 0x15f   :  { %v622_v23 = vadd.f32 %v621_v19, %v620_v8 }
 0x160   :  { %550 = vadd.xlane.f32.xlu0 %v549_v59 }
 0x161   :  { %v624_v37 = vadd.f32 %v623_v11, %v622_v23 }
 0x163   :  { %625 = vadd.xlane.f32.xlu2 %v624_v37 }
 0x176   :  { %s678_s3 = spop %677 }
 0x177   :  { %s680_s26 = spop %679 }
 0x178   :  { %s185_s27 = smul.f32 %s680_s26, %s678_s3  ;;  %s682_s28 = spop %681 }
 0x179   :  { %s255_s29 = smul.f32 %s682_s28, %s680_s26  ;;  %s684_s30 = spop %683 }
 0x17a   :  { %s186_s6 = ssub.f32 0.0, %s185_s27  ;;  %s329_s8 = smul.f32 %s684_s30, %s680_s26 }
 0x17b   :  { %s256_s9 = ssub.f32 0.0, %s255_s29  ;;  %s686_s10 = spop %685 }
 0x17c   :  { %s395_s12 = smul.f32 %s686_s10, %s680_s26  ;;  %s688_s18 = spop %687 }
 0x17d   :  { %s330_s11 = ssub.f32 %s256_s9, %s329_s8  ;;  %s653_s13 = smul.f32 0.5, %s186_s6 }
 0x17e   :  { %s1173_s15 = ssub.f32 0.0, %s395_s12  ;;  %s690_s4 = spop %689 }
 0x17f   :  { %s654_s14 = smul.f32 0.5, %s330_s11  ;;  %s429_s19 = sadd.f32 %s690_s4, %s688_s18 }
 0x180   :  { %s692_s21 = spop %691  ;;  %s666_s29 = sshll.u32 %s1192_s7, 4  ;;  %s667_s29 = int_to_ptr.hbm [resolvable:$true] %s666_s29 }
 0x181   :  { %s1175_s16 = sadd.f32 %s654_s14, %s653_s13  ;;  %s560_s20 = smul.f32 32.0, %s429_s19 }
 0x182   :  { %s634_s22 = smul.f32 32.0, %s692_s21  ;;  %s794_s8 = smov [#allocation2]  }
 0x183   :  { %s656_s17 = sadd.f32 %s1175_s16, %s1173_s15  ;;  %v561_v63 = vstv %s560_s20 }
 0x184   :  { %773 = vrcp.f32 %v561_v63  ;;  %v635_v39 = vstv %s634_s22  ;;  %v573_v53 = vand.u32 2147483648, %v561_v63  ;;  %vm567_vm5 = vweird.f32 %v561_v63 }
 0x185   :  { %775 = vrcp.f32 %v635_v39  ;;  %v571_v33 = vand.u32 2147483647, %v561_v63  ;;  %v647_v61 = vand.u32 2147483648, %v635_v39  ;;  %vm641_vm8 = vweird.f32 %v635_v39 }
 0x186   :  { %v574_v20 = vor.u32 1.1754944e-38, %v573_v53  ;;  %v645_v2 = vand.u32 2147483647, %v635_v39 }
 0x187   :  { %vm572_vm9 = vcmp.eq.f32.partialorder %v571_v33, 8.507059e+37  ;;  %v648_v51 = vor.u32 1.1754944e-38, %v647_v61 }
 0x188   :  { %vm646_vm11 = vcmp.eq.f32.partialorder %v645_v2, 8.507059e+37 }
 0x18a   :  { %v774_v45 = vpop.eup %773 }
 0x18b   :  { %v776_v0 = vpop.eup %775  ;;  %v563_v34 = vmul.f32 %v774_v45, %v561_v63  ;;  %vm568_vm4 = vweird.f32 %v774_v45 }
 0x18c   :  { %v637_v38 = vmul.f32 %v776_v0, %v635_v39  ;;  %vm569_vm6 = vmor %vm567_vm5, %vm568_vm4  ;;  %vm642_vm7 = vweird.f32 %v776_v0 }
 0x18d   :  { %v564_v35 = vsub.f32 1.0, %v563_v34  ;;  %vm643_vm10 = vmor %vm641_vm8, %vm642_vm7 }
 0x18e   :  { %v638_v25 = vsub.f32 1.0, %v637_v38 }
 0x18f   :  { %v565_v58 = vmul.f32 %v774_v45, %v564_v35 }
 0x190   :  { %v639_v10 = vmul.f32 %v776_v0, %v638_v25 }
 0x191   :  { %v566_v29 = vadd.f32 %v774_v45, %v565_v58 }
 0x192   :  { %v640_v46 = vadd.f32 %v776_v0, %v639_v10 }
 0x193   :  { %v570_v56 = vsel %vm569_vm6, %v774_v45, %v566_v29 }
 0x194   :  { %v575_v44 = vsel %vm572_vm9, %v574_v20, %v570_v56  ;;  %v644_v14 = vsel %vm643_vm10, %v776_v0, %v640_v46 }
 0x195   :  { %v649_v15 = vsel %vm646_vm11, %v648_v51, %v644_v14 }
 0x1c9   :  { %v495_v55 = vpop.xlane.xlu1 %494 }
 0x1ca   :  { %v496_v27 = vrot.slane %v495_v55, 4 }
 0x1cc   :  { %v497_v47 = vadd.f32 %v496_v27, %v495_v55 }
 0x1ce   :  { %v498_v7 = vrot.slane %v497_v47, 2 }
 0x1d0   :  { %v499_v40 = vadd.f32 %v498_v7, %v497_v47 }
 0x1d2   :  { %v500_v41 = vrot.slane %v499_v40, 1 }
 0x1d3   :  { %v551_v48 = vpop.xlane.xlu0 %550 }
 0x1d4   :  { %v552_v26 = vrot.slane %v551_v48, 4  ;;  %v501_v49 = vadd.f32 %v500_v41, %v499_v40 }
 0x1d6   :  { %v553_v18 = vadd.f32 %v552_v26, %v551_v48  ;;  %v626_v31 = vpop.xlane.xlu2 %625  ;;  %693 = vpush %v501_v49 }
 0x1d7   :  { %v627_v62 = vrot.slane %v626_v31, 4 }
 0x1d8   :  { %v554_v60 = vrot.slane %v553_v18, 2 }
 0x1d9   :  { %v628_v3 = vadd.f32 %v627_v62, %v626_v31 }
 0x1da   :  { %v555_v42 = vadd.f32 %v554_v60, %v553_v18 }
 0x1db   :  { %v629_v5 = vrot.slane %v628_v3, 2 }
 0x1dc   :  { %v556_v1 = vrot.slane %v555_v42, 1 }
 0x1dd   :  { %v630_v13 = vadd.f32 %v629_v5, %v628_v3 }
 0x1de   :  { %v557_v57 = vadd.f32 %v556_v1, %v555_v42 }
 0x1df   :  { %v631_v30 = vrot.slane %v630_v13, 1 }
 0x1e0   :  { %695 = vpush %v557_v57 }
 0x1e1   :  { %697 = vpush %v575_v44  ;;  %v632_v9 = vadd.f32 %v631_v30, %v630_v13 }
 0x1e3   :  { %699 = vpush %v632_v9 }
 0x1e4   :  { %701 = vpush %v649_v15 }
 0x207   :  { %s694_s23 = spop %693 }
 0x211   :  { %s696_s5 = spop %695 }
 0x212   :  { %s559_s24 = sadd.f32 %s696_s5, %s694_s23  ;;  %s698_s0 = spop %697 }
 0x214   :  { %s577_s1 = smul.f32 %s698_s0, %s559_s24  ;;  %s700_s2 = spop %699 }
 0x215   :  { %s702_s25 = spop %701 }
 0x216   :  { %s651_s3 = smul.f32 %s702_s25, %s700_s2 }
 0x218   :  { %s652_s26 = sadd.f32 %s651_s3, %s577_s1 }
 0x21a   :  { %s657_s30 = smul.f32 0.1, %s652_s26 }
 0x21c   :  { %s658_s6 = ssub.f32 %s656_s17, %s657_s30 }
 0x21e   :  { %660 = sst [smem:[#allocation2]] %s658_s6 }
 0x21f   :  { %669 = dma.smem_to_hbm %s794_s8, 16, %s667_s29, [#allocation3]  }
 0x220   :  { %789 = dma.done.wait [#allocation3], 16  }
 0x221   :  { %790 = vsyncadd [#allocation3], 4294967280 }
 0x222   :  { %674 = sfence }
 0x223   :  { %675 = vsyncpa [#allocation3], 1 }

</bundles_post_ra>
